<compile_context>
chip_gen: v5e
topology: v5e:2x2
jax: 0.10.0
libtpu: 0.0.40
codegen_flags: <defaults>
</compile_context>

<pallas_src>
import functools
import math

import numpy as np
import jax
import jax.numpy as jnp
from jax.experimental import pallas as pl
from jax.experimental.pallas import tpu as pltpu


# --------------------------------------------------------------------------
# Kernel
# --------------------------------------------------------------------------
def adaptive_block_kernel(xq_ref, xkv_ref,
                          wq_ref, bq_ref, wkv_ref, bkv_ref, wo_ref,
                          w1_ref, fb1_ref, w2_ref, fb2_ref,
                          o_ref,
                          k_scr, v_scr, ctx_scr,
                          *, num_heads, head_dim, compute_dtype, exp_dtype,
                          approx_recip, eps=1e-5):
    """One (batch, query-tile) step: LN1 -> gated MHSA -> +res -> LN2 -> FFN -> +res."""
    f32 = jnp.float32
    hdh = num_heads * head_dim

    def ln_normalize(v):                      # LN without affine (folded into weights)
        mu = jnp.mean(v, axis=-1, keepdims=True)
        var = jnp.mean((v - mu) ** 2, axis=-1, keepdims=True)
        return (v - mu) * jax.lax.rsqrt(var + eps)

    # ---- K/V for the whole sequence: computed once per batch, cached in VMEM.
    #      (query-tile axis is 'arbitrary'; scratch persists across it) ----
    @pl.when(pl.program_id(1) == 0)
    def _():
        hkv = ln_normalize(xkv_ref[0].astype(f32)).astype(compute_dtype)
        kv = jnp.dot(hkv, wkv_ref[...], preferred_element_type=f32) + bkv_ref[0]
        k_scr[...] = kv[:, :hdh].astype(compute_dtype)
        v_scr[...] = kv[:, hdh:].astype(compute_dtype)

    # ---- query tile: LN1 + fused Q projection (scale + LN1 affine folded) ----
    xq = xq_ref[0].astype(f32)                                    # (TQ, E) residual
    hq = ln_normalize(xq).astype(compute_dtype)
    q_all = jnp.dot(hq, wq_ref[...], preferred_element_type=f32) + bq_ref[0]
    q_all = q_all.astype(compute_dtype)                           # (TQ, H*Dh)

    # ---- per-head softmax attention; ctx written straight into VMEM scratch ----
    for h in range(num_heads):
        lo = h * head_dim
        qh = q_all[:, lo:lo + head_dim]                           # (TQ, Dh)
        kh = k_scr[:, lo:lo + head_dim]                           # (S,  Dh)
        vh = v_scr[:, lo:lo + head_dim]                           # (S,  Dh)
        scores = jax.lax.dot_general(                             # (TQ, S) f32
            qh, kh, dimension_numbers=(((1,), (1,)), ((), ())),
            preferred_element_type=f32)
        scores = scores - jnp.max(scores, axis=-1, keepdims=True)
        e = jnp.exp(scores.astype(exp_dtype))                     # bf16 EUP on v6e/v7x
        den = jnp.sum(e, axis=-1, keepdims=True, dtype=f32)
        inv_den = pl.reciprocal(den, approx=approx_recip)
        probs = (e * inv_den).astype(compute_dtype)
        ctx_scr[:, lo:lo + head_dim] = jnp.dot(
            probs, vh, preferred_element_type=f32).astype(compute_dtype)

    # ---- single fused output projection (gates + active-head norm folded) ----
    attn_out = jnp.dot(ctx_scr[...], wo_ref[...], preferred_element_type=f32)
    h1 = xq + attn_out                                            # dropout == identity

    # ---- FFN (LN2 affine folded into W1/b1): Linear -> exact GELU -> Linear ----
    h2 = ln_normalize(h1).astype(compute_dtype)
    inter = jnp.dot(h2, w1_ref[...], preferred_element_type=f32) + fb1_ref[0]
    inter = 0.5 * inter * (1.0 + jax.lax.erf(inter * (1.0 / math.sqrt(2.0))))
    ffn = jnp.dot(inter.astype(compute_dtype), w2_ref[...],
                  preferred_element_type=f32) + fb2_ref[0]

    o_ref[0] = (h1 + ffn).astype(o_ref.dtype)


# --------------------------------------------------------------------------
# Parameter repacking / folding
# --------------------------------------------------------------------------
def prepare_block_params(params, num_heads, compute_dtype=jnp.bfloat16,
                         prune_dead_heads=True):
    """Fuse per-head weights, fold LN affines / scale / gates, prune dead heads."""
    H = num_heads
    E, I = params["w1"].shape
    Dh = params["wq"].shape[-1]

    gate = jnp.asarray(params["gate"], jnp.float32)
    # Module semantics: heads with effective gate < 1e-4 skipped; output divided
    # by max(1, active/H) (== 1 since active <= H, kept for fidelity).
    gate_eff = jnp.where(gate > 1e-4, gate, 0.0)
    active = jnp.sum((gate > 1e-4).astype(jnp.float32))
    denom = jnp.maximum(1.0, active / H)

    wq = jnp.asarray(params["wq"], jnp.float32)
    wk = jnp.asarray(params["wk"], jnp.float32)
    wv = jnp.asarray(params["wv"], jnp.float32)
    wo = jnp.asarray(params["wo"], jnp.float32)

    keep = None
    if prune_dead_heads:
        try:  # only possible when gates are concrete (not traced)
            gate_np = np.asarray(jax.device_get(gate))
            keep_np = np.nonzero(gate_np > 1e-4)[0]
            if keep_np.size == 0:
                keep_np = np.array([0])      # keep one zero-gated head (output stays 0)
            if keep_np.size < H:
                keep = keep_np
        except Exception:
            keep = None                      # traced gates -> fold zeros instead
    if keep is not None:
        wq, wk, wv, wo = wq[keep], wk[keep], wv[keep], wo[keep]
        gate_eff = gate_eff[keep]
    H_eff = wq.shape[0]
    HDh = H_eff * Dh

    def fuse(w):                              # (H_eff, E, Dh) -> (E, H_eff*Dh)
        return jnp.transpose(w, (1, 0, 2)).reshape(E, HDh)

    scale = 1.0 / math.sqrt(Dh)               # attention scale folded into Q side
    wq_f = fuse(wq) * scale
    wkv_f = jnp.concatenate([fuse(wk), fuse(wv)], axis=-1)

    # Fold LN1 affine: (xhat*g1 + b1) @ W == xhat @ (g1[:,None]*W) + (b1 @ W)
    g1 = jnp.asarray(params["g1"], jnp.float32)
    b1 = jnp.asarray(params["b1"], jnp.float32)
    wq_eff = g1[:, None] * wq_f
    wkv_eff = g1[:, None] * wkv_f
    bq = (b1 @ wq_f).reshape(1, HDh)
    bkv = (b1 @ wkv_f).reshape(1, 2 * HDh)

    wo_eff = (wo * (gate_eff / denom)[:, None, None]).reshape(HDh, E)

    # Fold LN2 affine into the first FFN linear.
    g2 = jnp.asarray(params["g2"], jnp.float32)
    b2 = jnp.asarray(params["b2"], jnp.float32)
    w1 = jnp.asarray(params["w1"], jnp.float32)
    w1_eff = g2[:, None] * w1
    fb1_eff = (jnp.asarray(params["fb1"], jnp.float32) + b2 @ w1).reshape(1, I)

    c = lambda w: w.astype(compute_dtype)
    prep = {
        "wq": c(wq_eff), "bq": bq.astype(jnp.float32),
        "wkv": c(wkv_eff), "bkv": bkv.astype(jnp.float32),
        "wo": c(wo_eff),
        "w1": c(w1_eff), "fb1": fb1_eff.astype(jnp.float32),
        "w2": c(jnp.asarray(params["w2"], jnp.float32)),
        "fb2": jnp.asarray(params["fb2"], jnp.float32).reshape(1, E),
    }
    return prep, H_eff


# --------------------------------------------------------------------------
# Precision / tiling policy helpers
# --------------------------------------------------------------------------
def _precision_policy(compute_dtype):
    """Return (exp_dtype, approx_reciprocal) for the softmax."""
    if jnp.dtype(compute_dtype) != jnp.dtype(jnp.bfloat16):
        return jnp.float32, False
    try:
        kind = jax.devices()[0].device_kind.lower()
    except Exception:
        kind = ""
    bf16_eup = "v5" not in kind   # v5e has no bf16 EUP path
    return (jnp.bfloat16 if bf16_eup else jnp.float32), True


def _vmem_cap_bytes():
    try:
        return int(0.85 * pltpu.get_tpu_info().vmem_capacity_bytes)
    except Exception:
        return 48 * 1024 * 1024            # conservative (fits v7x's 64 MiB)


def _pick_query_tile(seq_len, budget_fn, cap):
    cands = [t for t in (1024, 512, 256, 128) if seq_len % t == 0]
    for t in cands:
        if budget_fn(t) <= cap:
            return t
    if cands:
        return cands[-1]
    return seq_len


# --------------------------------------------------------------------------
# Wrapper
# --------------------------------------------------------------------------
def adaptive_transformer_block(x, params, num_heads, compute_dtype=jnp.bfloat16,
                               out_dtype=None):
    B, S, E = x.shape
    Dh = E // num_heads
    I = params["w1"].shape[1]
    out_dtype = x.dtype if out_dtype is None else out_dtype

    prep, H_eff = prepare_block_params(params, num_heads, compute_dtype)
    HDh = H_eff * Dh

    exp_dtype, approx_recip = _precision_policy(compute_dtype)
    is_bf16 = jnp.dtype(compute_dtype) == jnp.dtype(jnp.bfloat16)
    x_kv = x.astype(jnp.bfloat16) if is_bf16 else x    # bf16 K/V operand (halves DMA)

    cd_bytes = jnp.dtype(compute_dtype).itemsize
    kv_bytes = jnp.dtype(x_kv.dtype).itemsize
    out_bytes = jnp.dtype(out_dtype).itemsize
    cap = _vmem_cap_bytes()

    def vmem_bytes(tq):
        w = cd_bytes * (3 * E * HDh + HDh * E + E * I + I * E)      # fused weights
        w += 4 * (3 * HDh + I + E)                                  # f32 biases
        w *= 2                                                      # worst case: double buffered
        blocks = 2 * (tq * E * 4 + S * E * kv_bytes + tq * E * out_bytes)
        scratch = cd_bytes * (2 * S * HDh + tq * HDh)               # K/V cache + ctx
        temps = 4 * (tq * S + tq * I + 2 * S * HDh + tq * HDh + S * E)
        return w + blocks + scratch + (3 * temps) // 2

    TQ = _pick_query_tile(S, vmem_bytes, cap)
    n_qt = S // TQ
    vmem_limit = int(min(cap, max(vmem_bytes(TQ), 16 * 1024 * 1024)))

    kernel = functools.partial(
        adaptive_block_kernel, num_heads=H_eff, head_dim=Dh,
        compute_dtype=compute_dtype, exp_dtype=exp_dtype,
        approx_recip=approx_recip)

    def build(single_buffer_weights):
        def wspec(shape):
            kwargs = {}
            if single_buffer_weights:
                kwargs["pipeline_mode"] = pl.Buffered(1)   # grid-invariant weights
            return pl.BlockSpec(shape, lambda b, t, _n=len(shape): (0,) * _n,
                                **kwargs)

        return pl.pallas_call(
            kernel,
            out_shape=jax.ShapeDtypeStruct((B, S, E), out_dtype),
            grid=(B, n_qt),
            in_specs=[
                pl.BlockSpec((1, TQ, E), lambda b, t: (b, t, 0)),   # query tile (f32)
                pl.BlockSpec((1, S, E), lambda b, t: (b, 0, 0)),    # full sequence (bf16)
                wspec((E, HDh)),          # fused W_q   (LN1 gamma + 1/sqrt(Dh) folded)
                wspec((1, HDh)),          # fused b_q
                wspec((E, 2 * HDh)),      # fused W_k | W_v
                wspec((1, 2 * HDh)),      # fused b_k | b_v
                wspec((HDh, E)),          # fused W_o   (gates + active-head norm folded)
                wspec((E, I)),            # FFN W1      (LN2 gamma folded)
                wspec((1, I)),            # FFN b1      (LN2 beta folded)
                wspec((I, E)),            # FFN W2
                wspec((1, E)),            # FFN b2
            ],
            out_specs=pl.BlockSpec((1, TQ, E), lambda b, t: (b, t, 0)),
            scratch_shapes=[
                pltpu.VMEM((S, HDh), compute_dtype),   # cached K (per batch)
                pltpu.VMEM((S, HDh), compute_dtype),   # cached V (per batch)
                pltpu.VMEM((TQ, HDh), compute_dtype),  # per-tile context
            ],
            compiler_params=pltpu.CompilerParams(
                # batch axis parallel (megacore / v7x 2-TC); query-tile axis must
                # be 'arbitrary' (K/V scratch carries across it).
                dimension_semantics=("parallel", "arbitrary"),
                vmem_limit_bytes=vmem_limit),
        )

    args = (x, x_kv, prep["wq"], prep["bq"], prep["wkv"], prep["bkv"],
            prep["wo"], prep["w1"], prep["fb1"], prep["w2"], prep["fb2"])
    try:
        return build(True)(*args)
    except Exception:
        # TODO(synk): pl.Buffered(1) single-buffering not supported by this
        # JAX/Mosaic build; fall back to default double-buffered weights.
        return build(False)(*args)


# --------------------------------------------------------------------------
# References
# --------------------------------------------------------------------------
def reference_forward_f32(x, p, H):
    """Pure-JAX f32 reference mirroring the PyTorch forward (eval mode)."""
    E = x.shape[-1]
    Dh = E // H

    def ln(v, g, b):
        mu = v.mean(-1, keepdims=True)
        var = ((v - mu) ** 2).mean(-1, keepdims=True)
        return (v - mu) / jnp.sqrt(var + 1e-5) * g + b

    h = ln(x, p["g1"], p["b1"])
    gate_eff = jnp.where(p["gate"] > 1e-4, p["gate"], 0.0)
    active = jnp.sum((gate_eff > 1e-4).astype(jnp.float32))
    attn = jnp.zeros_like(x)
    for i in range(H):
        q = h @ p["wq"][i]
        k = h @ p["wk"][i]
        v = h @ p["wv"][i]
        s = jnp.einsum("bqd,bkd->bqk", q, k) / math.sqrt(Dh)
        pr = jax.nn.softmax(s, axis=-1)
        attn = attn + gate_eff[i] * (jnp.einsum("bqk,bkd->bqd", pr, v) @ p["wo"][i])
    attn = attn / jnp.maximum(1.0, active / H)
    h1 = x + attn
    h2 = ln(h1, p["g2"], p["b2"])
    inter = jax.nn.gelu(h2 @ p["w1"] + p["fb1"], approximate=False)
    return h1 + inter @ p["w2"] + p["fb2"]


def reference_forward_mixed(x, prep, num_heads_eff, head_dim, exp_dtype, eps=1e-5):
    """Mirrors the kernel's precision policy (bf16 MXU operands, f32 accumulate)."""
    f32 = jnp.float32
    HDh = num_heads_eff * head_dim
    dt = prep["wq"].dtype

    def ln_norm(v):
        mu = v.mean(-1, keepdims=True)
        var = ((v - mu) ** 2).mean(-1, keepdims=True)
        return (v - mu) * jax.lax.rsqrt(var + eps)

    xf = x.astype(f32)
    hq = ln_norm(xf).astype(dt)
    x_kv = x.astype(dt).astype(f32) if dt == jnp.bfloat16 else xf
    hkv = ln_norm(x_kv).astype(dt)
    q = jnp.einsum("bse,ef->bsf", hq, prep["wq"],
                   preferred_element_type=f32) + prep["bq"][0]
    kv = jnp.einsum("bse,ef->bsf", hkv, prep["wkv"],
                    preferred_element_type=f32) + prep["bkv"][0]
    k, v = kv[..., :HDh].astype(dt), kv[..., HDh:].astype(dt)
    q = q.astype(dt)
    ctxs = []
    for hh in range(num_heads_eff):
        sl = slice(hh * head_dim, (hh + 1) * head_dim)
        s = jnp.einsum("bqd,bkd->bqk", q[..., sl], k[..., sl],
                       preferred_element_type=f32)
        s = s - s.max(-1, keepdims=True)
        e = jnp.exp(s.astype(exp_dtype))
        den = e.sum(-1, keepdims=True, dtype=f32)
        pr = (e / den).astype(dt)
        ctxs.append(jnp.einsum("bqk,bkd->bqd", pr, v[..., sl],
                               preferred_element_type=f32).astype(dt))
    ctx = jnp.concatenate(ctxs, axis=-1)
    attn = jnp.einsum("bsd,de->bse", ctx, prep["wo"], preferred_element_type=f32)
    h1 = xf + attn
    h2 = ln_norm(h1).astype(dt)
    inter = jnp.einsum("bse,ei->bsi", h2, prep["w1"],
                       preferred_element_type=f32) + prep["fb1"][0]
    inter = 0.5 * inter * (1.0 + jax.lax.erf(inter / math.sqrt(2.0)))
    ffn = jnp.einsum("bsi,ie->bse", inter.astype(dt), prep["w2"],
                     preferred_element_type=f32) + prep["fb2"][0]
    return h1 + ffn


# --------------------------------------------------------------------------
# Self-test
# --------------------------------------------------------------------------
if __name__ == "__main__":
    B, S, E, H = 2, 8, 32, 4
    Dh = E // H
    I = 4 * E

    key = jax.random.PRNGKey(0)
    ks = jax.random.split(key, 10)

    params = {
        # Gated MHSA per-head projections (randn / sqrt(fan_in), as in __init__)
        "wq": jax.random.normal(ks[0], (H, E, Dh), jnp.float32) / math.sqrt(E),
        "wk": jax.random.normal(ks[1], (H, E, Dh), jnp.float32) / math.sqrt(E),
        "wv": jax.random.normal(ks[2], (H, E, Dh), jnp.float32) / math.sqrt(E),
        "wo": jax.random.normal(ks[3], (H, Dh, E), jnp.float32) / math.sqrt(Dh),
        "gate": jnp.ones((H,), jnp.float32),
        # LayerNorms (default torch init: gamma=1, beta=0)
        "g1": jnp.ones((E,), jnp.float32), "b1": jnp.zeros((E,), jnp.float32),
        "g2": jnp.ones((E,), jnp.float32), "b2": jnp.zeros((E,), jnp.float32),
        # FFN linears
        "w1": jax.random.normal(ks[4], (E, I), jnp.float32) / math.sqrt(E),
        "fb1": jax.random.normal(ks[5], (I,), jnp.float32) * 0.02,
        "w2": jax.random.normal(ks[6], (I, E), jnp.float32) / math.sqrt(I),
        "fb2": jax.random.normal(ks[7], (E,), jnp.float32) * 0.02,
    }
    x = jax.random.normal(ks[8], (B, S, E), jnp.float32)

    # --- performance path: bf16 MXU operands, f32 accumulation ---
    out = adaptive_transformer_block(x, params, num_heads=H,
                                     compute_dtype=jnp.bfloat16)
    out = jax.block_until_ready(out)
    assert out.shape == (B, S, E)

    prep, H_eff = prepare_block_params(params, H, jnp.bfloat16)
    exp_dtype, _ = _precision_policy(jnp.bfloat16)
    ref_mixed = reference_forward_mixed(x, prep, H_eff, Dh, exp_dtype)
    assert jnp.allclose(out, ref_mixed, atol=5e-2, rtol=5e-2), \
        "mismatch vs mixed-precision JAX reference"

    # --- f32 path: validates module semantics without bf16 rounding ---
    out_f32 = adaptive_transformer_block(x, params, num_heads=H,
                                         compute_dtype=jnp.float32)
    out_f32 = jax.block_until_ready(out_f32)
    ref_f32 = reference_forward_f32(x, params, H)
    assert jnp.allclose(out_f32, ref_f32, atol=2e-3, rtol=2e-3), \
        "mismatch vs f32 JAX reference"

    print("KERNEL_OK")
</pallas_src>

<mosaic_0001>
module attributes {stable_mosaic.version = 11 : i64} {
  func.func @adaptive_block_kernel(%arg0: i32, %arg1: i32, %arg2: memref<1x8x32xf32, #tpu.memory_space<vmem>>, %arg3: memref<1x8x32xbf16, #tpu.memory_space<vmem>>, %arg4: memref<32x32xbf16, #tpu.memory_space<vmem>>, %arg5: memref<1x32xf32, #tpu.memory_space<vmem>>, %arg6: memref<32x64xbf16, #tpu.memory_space<vmem>>, %arg7: memref<1x64xf32, #tpu.memory_space<vmem>>, %arg8: memref<32x32xbf16, #tpu.memory_space<vmem>>, %arg9: memref<32x128xbf16, #tpu.memory_space<vmem>>, %arg10: memref<1x128xf32, #tpu.memory_space<vmem>>, %arg11: memref<128x32xbf16, #tpu.memory_space<vmem>>, %arg12: memref<1x32xf32, #tpu.memory_space<vmem>>, %arg13: memref<1x8x32xf32, #tpu.memory_space<vmem>>, %arg14: memref<8x32xbf16, #tpu.memory_space<vmem>>, %arg15: memref<8x32xbf16, #tpu.memory_space<vmem>>, %arg16: memref<8x32xbf16, #tpu.memory_space<vmem>>) attributes {dimension_semantics = [#tpu.dimension_semantics<parallel>, #tpu.dimension_semantics<arbitrary>], iteration_bounds = array<i64: 2, 1>, scalar_prefetch = 0 : i64, scratch_operands = 3 : i64, tpu.core_type = #tpu.core_type<tc>, window_params = [{transform_indices = @transform_0, window_bounds = array<i64: 1, 8, 32>}, {transform_indices = @transform_1, window_bounds = array<i64: 1, 8, 32>}, {pipeline_mode = #tpu.pipeline_mode<synchronous>, transform_indices = @transform_2, window_bounds = array<i64: 32, 32>}, {pipeline_mode = #tpu.pipeline_mode<synchronous>, transform_indices = @transform_3, window_bounds = array<i64: 1, 32>}, {pipeline_mode = #tpu.pipeline_mode<synchronous>, transform_indices = @transform_4, window_bounds = array<i64: 32, 64>}, {pipeline_mode = #tpu.pipeline_mode<synchronous>, transform_indices = @transform_5, window_bounds = array<i64: 1, 64>}, {pipeline_mode = #tpu.pipeline_mode<synchronous>, transform_indices = @transform_6, window_bounds = array<i64: 32, 32>}, {pipeline_mode = #tpu.pipeline_mode<synchronous>, transform_indices = @transform_7, window_bounds = array<i64: 32, 128>}, {pipeline_mode = #tpu.pipeline_mode<synchronous>, transform_indices = @transform_8, window_bounds = array<i64: 1, 128>}, {pipeline_mode = #tpu.pipeline_mode<synchronous>, transform_indices = @transform_9, window_bounds = array<i64: 128, 32>}, {pipeline_mode = #tpu.pipeline_mode<synchronous>, transform_indices = @transform_10, window_bounds = array<i64: 1, 32>}, {transform_indices = @transform_11, window_bounds = array<i64: 1, 8, 32>}]} {
    %c0_i32 = arith.constant 0 : i32
    %0 = arith.cmpi eq, %arg1, %c0_i32 : i32
    %1 = arith.extui %0 : i1 to i32
    %c0_i32_0 = arith.constant 0 : i32
    %2 = arith.cmpi ne, %1, %c0_i32_0 : i32
    scf.if %2 {
      %c0_75 = arith.constant 0 : index
      %c0_76 = arith.constant 0 : index
      %c0_77 = arith.constant 0 : index
      %166 = vector.load %arg3[%c0_75, %c0_76, %c0_77] : memref<1x8x32xbf16, #tpu.memory_space<vmem>>, vector<1x8x32xbf16>
      %167 = vector.shape_cast %166 : vector<1x8x32xbf16> to vector<8x32xbf16>
      %168 = arith.extf %167 : vector<8x32xbf16> to vector<8x32xf32>
      %cst_78 = arith.constant dense<0.000000e+00> : vector<8xf32>
      %169 = vector.multi_reduction <add>, %168, %cst_78 [1] : vector<8x32xf32> to vector<8xf32>
      %170 = vector.shape_cast %169 : vector<8xf32> to vector<8x1xf32>
      %cst_79 = arith.constant 3.200000e+01 : f32
      %171 = vector.broadcast %cst_79 : f32 to vector<8x1xf32>
      %172 = arith.divf %170, %171 : vector<8x1xf32>
      %173 = vector.broadcast %172 : vector<8x1xf32> to vector<8x32xf32>
      %174 = arith.subf %168, %173 : vector<8x32xf32>
      %175 = arith.mulf %174, %174 : vector<8x32xf32>
      %cst_80 = arith.constant dense<0.000000e+00> : vector<8xf32>
      %176 = vector.multi_reduction <add>, %175, %cst_80 [1] : vector<8x32xf32> to vector<8xf32>
      %177 = vector.shape_cast %176 : vector<8xf32> to vector<8x1xf32>
      %cst_81 = arith.constant 3.200000e+01 : f32
      %178 = vector.broadcast %cst_81 : f32 to vector<8x1xf32>
      %179 = arith.divf %177, %178 : vector<8x1xf32>
      %180 = vector.broadcast %172 : vector<8x1xf32> to vector<8x32xf32>
      %181 = arith.subf %168, %180 : vector<8x32xf32>
      %cst_82 = arith.constant 9.99999974E-6 : f32
      %182 = vector.broadcast %cst_82 : f32 to vector<8x1xf32>
      %183 = arith.addf %179, %182 : vector<8x1xf32>
      %184 = math.rsqrt %183 : vector<8x1xf32>
      %185 = vector.broadcast %184 : vector<8x1xf32> to vector<8x32xf32>
      %186 = arith.mulf %181, %185 : vector<8x32xf32>
      %187 = arith.truncf %186 : vector<8x32xf32> to vector<8x32xbf16>
      %c0_83 = arith.constant 0 : index
      %c0_84 = arith.constant 0 : index
      %188 = vector.load %arg6[%c0_83, %c0_84] : memref<32x64xbf16, #tpu.memory_space<vmem>>, vector<32x64xbf16>
      %cst_85 = arith.constant dense<0.000000e+00> : vector<8x64xf32>
      %189 = tpu.matmul %187, %188, %cst_85 {dimension_numbers = #tpu.dot_dimension_numbers<[1], [0], [0], [1], [0, 0, 1, 1], [], []>} : vector<8x32xbf16>, vector<32x64xbf16>, vector<8x64xf32> -> vector<8x64xf32>
      %c0_86 = arith.constant 0 : index
      %c0_87 = arith.constant 0 : index
      %190 = vector.load %arg7[%c0_86, %c0_87] : memref<1x64xf32, #tpu.memory_space<vmem>>, vector<1x64xf32>
      %191 = vector.shape_cast %190 : vector<1x64xf32> to vector<64xf32>
      %192 = vector.shape_cast %191 : vector<64xf32> to vector<1x64xf32>
      %193 = vector.broadcast %192 : vector<1x64xf32> to vector<8x64xf32>
      %194 = arith.addf %189, %193 : vector<8x64xf32>
      %195 = vector.extract_strided_slice %194 {offsets = [0, 0], sizes = [8, 32], strides = [1, 1]} : vector<8x64xf32> to vector<8x32xf32>
      %196 = arith.truncf %195 : vector<8x32xf32> to vector<8x32xbf16>
      %c0_88 = arith.constant 0 : index
      %c0_89 = arith.constant 0 : index
      %197 = vector.load %arg14[%c0_88, %c0_89] : memref<8x32xbf16, #tpu.memory_space<vmem>>, vector<8x32xbf16>
      tpu.vector_store %arg14[%c0_88, %c0_89], %196 {strides = array<i32>} : memref<8x32xbf16, #tpu.memory_space<vmem>>, vector<8x32xbf16>,
      %198 = vector.extract_strided_slice %194 {offsets = [0, 32], sizes = [8, 32], strides = [1, 1]} : vector<8x64xf32> to vector<8x32xf32>
      %199 = arith.truncf %198 : vector<8x32xf32> to vector<8x32xbf16>
      %c0_90 = arith.constant 0 : index
      %c0_91 = arith.constant 0 : index
      %200 = vector.load %arg15[%c0_90, %c0_91] : memref<8x32xbf16, #tpu.memory_space<vmem>>, vector<8x32xbf16>
      tpu.vector_store %arg15[%c0_90, %c0_91], %199 {strides = array<i32>} : memref<8x32xbf16, #tpu.memory_space<vmem>>, vector<8x32xbf16>,
    } else {
    }
    %c0 = arith.constant 0 : index
    %c0_1 = arith.constant 0 : index
    %c0_2 = arith.constant 0 : index
    %3 = vector.load %arg2[%c0, %c0_1, %c0_2] : memref<1x8x32xf32, #tpu.memory_space<vmem>>, vector<1x8x32xf32>
    %4 = vector.shape_cast %3 : vector<1x8x32xf32> to vector<8x32xf32>
    %cst = arith.constant dense<0.000000e+00> : vector<8xf32>
    %5 = vector.multi_reduction <add>, %4, %cst [1] : vector<8x32xf32> to vector<8xf32>
    %6 = vector.shape_cast %5 : vector<8xf32> to vector<8x1xf32>
    %cst_3 = arith.constant 3.200000e+01 : f32
    %7 = vector.broadcast %cst_3 : f32 to vector<8x1xf32>
    %8 = arith.divf %6, %7 : vector<8x1xf32>
    %9 = vector.broadcast %8 : vector<8x1xf32> to vector<8x32xf32>
    %10 = arith.subf %4, %9 : vector<8x32xf32>
    %11 = arith.mulf %10, %10 : vector<8x32xf32>
    %cst_4 = arith.constant dense<0.000000e+00> : vector<8xf32>
    %12 = vector.multi_reduction <add>, %11, %cst_4 [1] : vector<8x32xf32> to vector<8xf32>
    %13 = vector.shape_cast %12 : vector<8xf32> to vector<8x1xf32>
    %cst_5 = arith.constant 3.200000e+01 : f32
    %14 = vector.broadcast %cst_5 : f32 to vector<8x1xf32>
    %15 = arith.divf %13, %14 : vector<8x1xf32>
    %16 = vector.broadcast %8 : vector<8x1xf32> to vector<8x32xf32>
    %17 = arith.subf %4, %16 : vector<8x32xf32>
    %cst_6 = arith.constant 9.99999974E-6 : f32
    %18 = vector.broadcast %cst_6 : f32 to vector<8x1xf32>
    %19 = arith.addf %15, %18 : vector<8x1xf32>
    %20 = math.rsqrt %19 : vector<8x1xf32>
    %21 = vector.broadcast %20 : vector<8x1xf32> to vector<8x32xf32>
    %22 = arith.mulf %17, %21 : vector<8x32xf32>
    %23 = arith.truncf %22 : vector<8x32xf32> to vector<8x32xbf16>
    %c0_7 = arith.constant 0 : index
    %c0_8 = arith.constant 0 : index
    %24 = vector.load %arg4[%c0_7, %c0_8] : memref<32x32xbf16, #tpu.memory_space<vmem>>, vector<32x32xbf16>
    %cst_9 = arith.constant dense<0.000000e+00> : vector<8x32xf32>
    %25 = tpu.matmul %23, %24, %cst_9 {dimension_numbers = #tpu.dot_dimension_numbers<[1], [0], [0], [1], [0, 0, 1, 1], [], []>} : vector<8x32xbf16>, vector<32x32xbf16>, vector<8x32xf32> -> vector<8x32xf32>
    %c0_10 = arith.constant 0 : index
    %c0_11 = arith.constant 0 : index
    %26 = vector.load %arg5[%c0_10, %c0_11] : memref<1x32xf32, #tpu.memory_space<vmem>>, vector<1x32xf32>
    %27 = vector.shape_cast %26 : vector<1x32xf32> to vector<32xf32>
    %28 = vector.shape_cast %27 : vector<32xf32> to vector<1x32xf32>
    %29 = vector.broadcast %28 : vector<1x32xf32> to vector<8x32xf32>
    %30 = arith.addf %25, %29 : vector<8x32xf32>
    %31 = arith.truncf %30 : vector<8x32xf32> to vector<8x32xbf16>
    %32 = vector.extract_strided_slice %31 {offsets = [0, 0], sizes = [8, 8], strides = [1, 1]} : vector<8x32xbf16> to vector<8x8xbf16>
    %c0_12 = arith.constant 0 : index
    %c0_13 = arith.constant 0 : index
    %33 = vector.load %arg14[%c0_12, %c0_13] : memref<8x32xbf16, #tpu.memory_space<vmem>>, vector<8x8xbf16>
    %c0_14 = arith.constant 0 : index
    %c0_15 = arith.constant 0 : index
    %34 = vector.load %arg15[%c0_14, %c0_15] : memref<8x32xbf16, #tpu.memory_space<vmem>>, vector<8x8xbf16>
    %cst_16 = arith.constant dense<0.000000e+00> : vector<8x8xf32>
    %35 = tpu.matmul %32, %33, %cst_16 {dimension_numbers = #tpu.dot_dimension_numbers<[1], [1], [0], [0], [0, 0, 1, 0], [], []>} : vector<8x8xbf16>, vector<8x8xbf16>, vector<8x8xf32> -> vector<8x8xf32>
    %cst_17 = arith.constant dense<0xFF800000> : vector<8xf32>
    %36 = vector.multi_reduction <maximumf>, %35, %cst_17 [1] : vector<8x8xf32> to vector<8xf32>
    %37 = vector.shape_cast %36 : vector<8xf32> to vector<8x1xf32>
    %38 = vector.broadcast %37 : vector<8x1xf32> to vector<8x8xf32>
    %39 = arith.subf %35, %38 : vector<8x8xf32>
    %40 = arith.truncf %39 : vector<8x8xf32> to vector<8x8xbf16>
    %41 = math.exp %40 : vector<8x8xbf16>
    %42 = arith.extf %41 : vector<8x8xbf16> to vector<8x8xf32>
    %cst_18 = arith.constant dense<0.000000e+00> : vector<8xf32>
    %43 = vector.multi_reduction <add>, %42, %cst_18 [1] : vector<8x8xf32> to vector<8xf32>
    %44 = vector.shape_cast %43 : vector<8xf32> to vector<8x1xf32>
    %45 = tpu.reciprocal %44 {approx = true} : vector<8x1xf32> -> vector<8x1xf32>
    %46 = arith.extf %41 : vector<8x8xbf16> to vector<8x8xf32>
    %47 = vector.broadcast %45 : vector<8x1xf32> to vector<8x8xf32>
    %48 = arith.mulf %46, %47 : vector<8x8xf32>
    %49 = arith.truncf %48 : vector<8x8xf32> to vector<8x8xbf16>
    %cst_19 = arith.constant dense<0.000000e+00> : vector<8x8xf32>
    %50 = tpu.matmul %49, %34, %cst_19 {dimension_numbers = #tpu.dot_dimension_numbers<[1], [0], [0], [1], [0, 0, 1, 1], [], []>} : vector<8x8xbf16>, vector<8x8xbf16>, vector<8x8xf32> -> vector<8x8xf32>
    %51 = arith.truncf %50 : vector<8x8xf32> to vector<8x8xbf16>
    %c0_20 = arith.constant 0 : index
    %c0_21 = arith.constant 0 : index
    %52 = vector.load %arg16[%c0_20, %c0_21] : memref<8x32xbf16, #tpu.memory_space<vmem>>, vector<8x8xbf16>
    tpu.vector_store %arg16[%c0_20, %c0_21], %51 {strides = array<i32>} : memref<8x32xbf16, #tpu.memory_space<vmem>>, vector<8x8xbf16>,
    %53 = vector.extract_strided_slice %31 {offsets = [0, 8], sizes = [8, 8], strides = [1, 1]} : vector<8x32xbf16> to vector<8x8xbf16>
    %c0_22 = arith.constant 0 : index
    %c8 = arith.constant 8 : index
    %54 = vector.load %arg14[%c0_22, %c8] : memref<8x32xbf16, #tpu.memory_space<vmem>>, vector<8x8xbf16>
    %c0_23 = arith.constant 0 : index
    %c8_24 = arith.constant 8 : index
    %55 = vector.load %arg15[%c0_23, %c8_24] : memref<8x32xbf16, #tpu.memory_space<vmem>>, vector<8x8xbf16>
    %cst_25 = arith.constant dense<0.000000e+00> : vector<8x8xf32>
    %56 = tpu.matmul %53, %54, %cst_25 {dimension_numbers = #tpu.dot_dimension_numbers<[1], [1], [0], [0], [0, 0, 1, 0], [], []>} : vector<8x8xbf16>, vector<8x8xbf16>, vector<8x8xf32> -> vector<8x8xf32>
    %cst_26 = arith.constant dense<0xFF800000> : vector<8xf32>
    %57 = vector.multi_reduction <maximumf>, %56, %cst_26 [1] : vector<8x8xf32> to vector<8xf32>
    %58 = vector.shape_cast %57 : vector<8xf32> to vector<8x1xf32>
    %59 = vector.broadcast %58 : vector<8x1xf32> to vector<8x8xf32>
    %60 = arith.subf %56, %59 : vector<8x8xf32>
    %61 = arith.truncf %60 : vector<8x8xf32> to vector<8x8xbf16>
    %62 = math.exp %61 : vector<8x8xbf16>
    %63 = arith.extf %62 : vector<8x8xbf16> to vector<8x8xf32>
    %cst_27 = arith.constant dense<0.000000e+00> : vector<8xf32>
    %64 = vector.multi_reduction <add>, %63, %cst_27 [1] : vector<8x8xf32> to vector<8xf32>
    %65 = vector.shape_cast %64 : vector<8xf32> to vector<8x1xf32>
    %66 = tpu.reciprocal %65 {approx = true} : vector<8x1xf32> -> vector<8x1xf32>
    %67 = arith.extf %62 : vector<8x8xbf16> to vector<8x8xf32>
    %68 = vector.broadcast %66 : vector<8x1xf32> to vector<8x8xf32>
    %69 = arith.mulf %67, %68 : vector<8x8xf32>
    %70 = arith.truncf %69 : vector<8x8xf32> to vector<8x8xbf16>
    %cst_28 = arith.constant dense<0.000000e+00> : vector<8x8xf32>
    %71 = tpu.matmul %70, %55, %cst_28 {dimension_numbers = #tpu.dot_dimension_numbers<[1], [0], [0], [1], [0, 0, 1, 1], [], []>} : vector<8x8xbf16>, vector<8x8xbf16>, vector<8x8xf32> -> vector<8x8xf32>
    %72 = arith.truncf %71 : vector<8x8xf32> to vector<8x8xbf16>
    %c0_29 = arith.constant 0 : index
    %c8_30 = arith.constant 8 : index
    %73 = vector.load %arg16[%c0_29, %c8_30] : memref<8x32xbf16, #tpu.memory_space<vmem>>, vector<8x8xbf16>
    tpu.vector_store %arg16[%c0_29, %c8_30], %72 {strides = array<i32>} : memref<8x32xbf16, #tpu.memory_space<vmem>>, vector<8x8xbf16>,
    %74 = vector.extract_strided_slice %31 {offsets = [0, 16], sizes = [8, 8], strides = [1, 1]} : vector<8x32xbf16> to vector<8x8xbf16>
    %c0_31 = arith.constant 0 : index
    %c16 = arith.constant 16 : index
    %75 = vector.load %arg14[%c0_31, %c16] : memref<8x32xbf16, #tpu.memory_space<vmem>>, vector<8x8xbf16>
    %c0_32 = arith.constant 0 : index
    %c16_33 = arith.constant 16 : index
    %76 = vector.load %arg15[%c0_32, %c16_33] : memref<8x32xbf16, #tpu.memory_space<vmem>>, vector<8x8xbf16>
    %cst_34 = arith.constant dense<0.000000e+00> : vector<8x8xf32>
    %77 = tpu.matmul %74, %75, %cst_34 {dimension_numbers = #tpu.dot_dimension_numbers<[1], [1], [0], [0], [0, 0, 1, 0], [], []>} : vector<8x8xbf16>, vector<8x8xbf16>, vector<8x8xf32> -> vector<8x8xf32>
    %cst_35 = arith.constant dense<0xFF800000> : vector<8xf32>
    %78 = vector.multi_reduction <maximumf>, %77, %cst_35 [1] : vector<8x8xf32> to vector<8xf32>
    %79 = vector.shape_cast %78 : vector<8xf32> to vector<8x1xf32>
    %80 = vector.broadcast %79 : vector<8x1xf32> to vector<8x8xf32>
    %81 = arith.subf %77, %80 : vector<8x8xf32>
    %82 = arith.truncf %81 : vector<8x8xf32> to vector<8x8xbf16>
    %83 = math.exp %82 : vector<8x8xbf16>
    %84 = arith.extf %83 : vector<8x8xbf16> to vector<8x8xf32>
    %cst_36 = arith.constant dense<0.000000e+00> : vector<8xf32>
    %85 = vector.multi_reduction <add>, %84, %cst_36 [1] : vector<8x8xf32> to vector<8xf32>
    %86 = vector.shape_cast %85 : vector<8xf32> to vector<8x1xf32>
    %87 = tpu.reciprocal %86 {approx = true} : vector<8x1xf32> -> vector<8x1xf32>
    %88 = arith.extf %83 : vector<8x8xbf16> to vector<8x8xf32>
    %89 = vector.broadcast %87 : vector<8x1xf32> to vector<8x8xf32>
    %90 = arith.mulf %88, %89 : vector<8x8xf32>
    %91 = arith.truncf %90 : vector<8x8xf32> to vector<8x8xbf16>
    %cst_37 = arith.constant dense<0.000000e+00> : vector<8x8xf32>
    %92 = tpu.matmul %91, %76, %cst_37 {dimension_numbers = #tpu.dot_dimension_numbers<[1], [0], [0], [1], [0, 0, 1, 1], [], []>} : vector<8x8xbf16>, vector<8x8xbf16>, vector<8x8xf32> -> vector<8x8xf32>
    %93 = arith.truncf %92 : vector<8x8xf32> to vector<8x8xbf16>
    %c0_38 = arith.constant 0 : index
    %c16_39 = arith.constant 16 : index
    %94 = vector.load %arg16[%c0_38, %c16_39] : memref<8x32xbf16, #tpu.memory_space<vmem>>, vector<8x8xbf16>
    tpu.vector_store %arg16[%c0_38, %c16_39], %93 {strides = array<i32>} : memref<8x32xbf16, #tpu.memory_space<vmem>>, vector<8x8xbf16>,
    %95 = vector.extract_strided_slice %31 {offsets = [0, 24], sizes = [8, 8], strides = [1, 1]} : vector<8x32xbf16> to vector<8x8xbf16>
    %c0_40 = arith.constant 0 : index
    %c24 = arith.constant 24 : index
    %96 = vector.load %arg14[%c0_40, %c24] : memref<8x32xbf16, #tpu.memory_space<vmem>>, vector<8x8xbf16>
    %c0_41 = arith.constant 0 : index
    %c24_42 = arith.constant 24 : index
    %97 = vector.load %arg15[%c0_41, %c24_42] : memref<8x32xbf16, #tpu.memory_space<vmem>>, vector<8x8xbf16>
    %cst_43 = arith.constant dense<0.000000e+00> : vector<8x8xf32>
    %98 = tpu.matmul %95, %96, %cst_43 {dimension_numbers = #tpu.dot_dimension_numbers<[1], [1], [0], [0], [0, 0, 1, 0], [], []>} : vector<8x8xbf16>, vector<8x8xbf16>, vector<8x8xf32> -> vector<8x8xf32>
    %cst_44 = arith.constant dense<0xFF800000> : vector<8xf32>
    %99 = vector.multi_reduction <maximumf>, %98, %cst_44 [1] : vector<8x8xf32> to vector<8xf32>
    %100 = vector.shape_cast %99 : vector<8xf32> to vector<8x1xf32>
    %101 = vector.broadcast %100 : vector<8x1xf32> to vector<8x8xf32>
    %102 = arith.subf %98, %101 : vector<8x8xf32>
    %103 = arith.truncf %102 : vector<8x8xf32> to vector<8x8xbf16>
    %104 = math.exp %103 : vector<8x8xbf16>
    %105 = arith.extf %104 : vector<8x8xbf16> to vector<8x8xf32>
    %cst_45 = arith.constant dense<0.000000e+00> : vector<8xf32>
    %106 = vector.multi_reduction <add>, %105, %cst_45 [1] : vector<8x8xf32> to vector<8xf32>
    %107 = vector.shape_cast %106 : vector<8xf32> to vector<8x1xf32>
    %108 = tpu.reciprocal %107 {approx = true} : vector<8x1xf32> -> vector<8x1xf32>
    %109 = arith.extf %104 : vector<8x8xbf16> to vector<8x8xf32>
    %110 = vector.broadcast %108 : vector<8x1xf32> to vector<8x8xf32>
    %111 = arith.mulf %109, %110 : vector<8x8xf32>
    %112 = arith.truncf %111 : vector<8x8xf32> to vector<8x8xbf16>
    %cst_46 = arith.constant dense<0.000000e+00> : vector<8x8xf32>
    %113 = tpu.matmul %112, %97, %cst_46 {dimension_numbers = #tpu.dot_dimension_numbers<[1], [0], [0], [1], [0, 0, 1, 1], [], []>} : vector<8x8xbf16>, vector<8x8xbf16>, vector<8x8xf32> -> vector<8x8xf32>
    %114 = arith.truncf %113 : vector<8x8xf32> to vector<8x8xbf16>
    %c0_47 = arith.constant 0 : index
    %c24_48 = arith.constant 24 : index
    %115 = vector.load %arg16[%c0_47, %c24_48] : memref<8x32xbf16, #tpu.memory_space<vmem>>, vector<8x8xbf16>
    tpu.vector_store %arg16[%c0_47, %c24_48], %114 {strides = array<i32>} : memref<8x32xbf16, #tpu.memory_space<vmem>>, vector<8x8xbf16>,
    %c0_49 = arith.constant 0 : index
    %c0_50 = arith.constant 0 : index
    %116 = vector.load %arg16[%c0_49, %c0_50] : memref<8x32xbf16, #tpu.memory_space<vmem>>, vector<8x32xbf16>
    %c0_51 = arith.constant 0 : index
    %c0_52 = arith.constant 0 : index
    %117 = vector.load %arg8[%c0_51, %c0_52] : memref<32x32xbf16, #tpu.memory_space<vmem>>, vector<32x32xbf16>
    %cst_53 = arith.constant dense<0.000000e+00> : vector<8x32xf32>
    %118 = tpu.matmul %116, %117, %cst_53 {dimension_numbers = #tpu.dot_dimension_numbers<[1], [0], [0], [1], [0, 0, 1, 1], [], []>} : vector<8x32xbf16>, vector<32x32xbf16>, vector<8x32xf32> -> vector<8x32xf32>
    %119 = arith.addf %4, %118 : vector<8x32xf32>
    %cst_54 = arith.constant dense<0.000000e+00> : vector<8xf32>
    %120 = vector.multi_reduction <add>, %119, %cst_54 [1] : vector<8x32xf32> to vector<8xf32>
    %121 = vector.shape_cast %120 : vector<8xf32> to vector<8x1xf32>
    %cst_55 = arith.constant 3.200000e+01 : f32
    %122 = vector.broadcast %cst_55 : f32 to vector<8x1xf32>
    %123 = arith.divf %121, %122 : vector<8x1xf32>
    %124 = vector.broadcast %123 : vector<8x1xf32> to vector<8x32xf32>
    %125 = arith.subf %119, %124 : vector<8x32xf32>
    %126 = arith.mulf %125, %125 : vector<8x32xf32>
    %cst_56 = arith.constant dense<0.000000e+00> : vector<8xf32>
    %127 = vector.multi_reduction <add>, %126, %cst_56 [1] : vector<8x32xf32> to vector<8xf32>
    %128 = vector.shape_cast %127 : vector<8xf32> to vector<8x1xf32>
    %cst_57 = arith.constant 3.200000e+01 : f32
    %129 = vector.broadcast %cst_57 : f32 to vector<8x1xf32>
    %130 = arith.divf %128, %129 : vector<8x1xf32>
    %131 = vector.broadcast %123 : vector<8x1xf32> to vector<8x32xf32>
    %132 = arith.subf %119, %131 : vector<8x32xf32>
    %cst_58 = arith.constant 9.99999974E-6 : f32
    %133 = vector.broadcast %cst_58 : f32 to vector<8x1xf32>
    %134 = arith.addf %130, %133 : vector<8x1xf32>
    %135 = math.rsqrt %134 : vector<8x1xf32>
    %136 = vector.broadcast %135 : vector<8x1xf32> to vector<8x32xf32>
    %137 = arith.mulf %132, %136 : vector<8x32xf32>
    %138 = arith.truncf %137 : vector<8x32xf32> to vector<8x32xbf16>
    %c0_59 = arith.constant 0 : index
    %c0_60 = arith.constant 0 : index
    %139 = vector.load %arg9[%c0_59, %c0_60] : memref<32x128xbf16, #tpu.memory_space<vmem>>, vector<32x128xbf16>
    %cst_61 = arith.constant dense<0.000000e+00> : vector<8x128xf32>
    %140 = tpu.matmul %138, %139, %cst_61 {dimension_numbers = #tpu.dot_dimension_numbers<[1], [0], [0], [1], [0, 0, 1, 1], [], []>} : vector<8x32xbf16>, vector<32x128xbf16>, vector<8x128xf32> -> vector<8x128xf32>
    %c0_62 = arith.constant 0 : index
    %c0_63 = arith.constant 0 : index
    %141 = vector.load %arg10[%c0_62, %c0_63] : memref<1x128xf32, #tpu.memory_space<vmem>>, vector<1x128xf32>
    %142 = vector.shape_cast %141 : vector<1x128xf32> to vector<128xf32>
    %143 = vector.shape_cast %142 : vector<128xf32> to vector<1x128xf32>
    %144 = vector.broadcast %143 : vector<1x128xf32> to vector<8x128xf32>
    %145 = arith.addf %140, %144 : vector<8x128xf32>
    %cst_64 = arith.constant 5.000000e-01 : f32
    %146 = vector.broadcast %cst_64 : f32 to vector<8x128xf32>
    %147 = arith.mulf %146, %145 : vector<8x128xf32>
    %cst_65 = arith.constant 0.707106769 : f32
    %148 = vector.broadcast %cst_65 : f32 to vector<8x128xf32>
    %149 = arith.mulf %145, %148 : vector<8x128xf32>
    %150 = math.erf %149 : vector<8x128xf32>
    %cst_66 = arith.constant 1.000000e+00 : f32
    %151 = vector.broadcast %cst_66 : f32 to vector<8x128xf32>
    %152 = arith.addf %151, %150 : vector<8x128xf32>
    %153 = arith.mulf %147, %152 : vector<8x128xf32>
    %154 = arith.truncf %153 : vector<8x128xf32> to vector<8x128xbf16>
    %c0_67 = arith.constant 0 : index
    %c0_68 = arith.constant 0 : index
    %155 = vector.load %arg11[%c0_67, %c0_68] : memref<128x32xbf16, #tpu.memory_space<vmem>>, vector<128x32xbf16>
    %cst_69 = arith.constant dense<0.000000e+00> : vector<8x32xf32>
    %156 = tpu.matmul %154, %155, %cst_69 {dimension_numbers = #tpu.dot_dimension_numbers<[1], [0], [0], [1], [0, 0, 1, 1], [], []>} : vector<8x128xbf16>, vector<128x32xbf16>, vector<8x32xf32> -> vector<8x32xf32>
    %c0_70 = arith.constant 0 : index
    %c0_71 = arith.constant 0 : index
    %157 = vector.load %arg12[%c0_70, %c0_71] : memref<1x32xf32, #tpu.memory_space<vmem>>, vector<1x32xf32>
    %158 = vector.shape_cast %157 : vector<1x32xf32> to vector<32xf32>
    %159 = vector.shape_cast %158 : vector<32xf32> to vector<1x32xf32>
    %160 = vector.broadcast %159 : vector<1x32xf32> to vector<8x32xf32>
    %161 = arith.addf %156, %160 : vector<8x32xf32>
    %162 = arith.addf %119, %161 : vector<8x32xf32>
    %c0_72 = arith.constant 0 : index
    %c0_73 = arith.constant 0 : index
    %c0_74 = arith.constant 0 : index
    %163 = vector.load %arg13[%c0_72, %c0_73, %c0_74] : memref<1x8x32xf32, #tpu.memory_space<vmem>>, vector<1x8x32xf32>
    %164 = vector.shape_cast %163 : vector<1x8x32xf32> to vector<8x32xf32>
    %165 = vector.shape_cast %162 : vector<8x32xf32> to vector<1x8x32xf32>
    tpu.vector_store %arg13[%c0_72, %c0_73, %c0_74], %165 {strides = array<i32>} : memref<1x8x32xf32, #tpu.memory_space<vmem>>, vector<1x8x32xf32>,
    return
  }
  func.func @transform_0(%arg0: i32, %arg1: i32) -> (i32, i32, i32) {
    %c0_i32 = arith.constant 0 : i32
    %c0_i32_0 = arith.constant 0 : i32
    return %arg0, %arg1, %c0_i32 : i32, i32, i32
  }
  func.func @transform_1(%arg0: i32, %arg1: i32) -> (i32, i32, i32) {
    %c0_i32 = arith.constant 0 : i32
    %c0_i32_0 = arith.constant 0 : i32
    %c0_i32_1 = arith.constant 0 : i32
    return %arg0, %c0_i32, %c0_i32_0 : i32, i32, i32
  }
  func.func @transform_2(%arg0: i32, %arg1: i32) -> (i32, i32) {
    %c0_i32 = arith.constant 0 : i32
    %c0_i32_0 = arith.constant 0 : i32
    %c0_i32_1 = arith.constant 0 : i32
    return %c0_i32, %c0_i32_0 : i32, i32
  }
  func.func @transform_3(%arg0: i32, %arg1: i32) -> (i32, i32) {
    %c0_i32 = arith.constant 0 : i32
    %c0_i32_0 = arith.constant 0 : i32
    %c0_i32_1 = arith.constant 0 : i32
    return %c0_i32, %c0_i32_0 : i32, i32
  }
  func.func @transform_4(%arg0: i32, %arg1: i32) -> (i32, i32) {
    %c0_i32 = arith.constant 0 : i32
    %c0_i32_0 = arith.constant 0 : i32
    %c0_i32_1 = arith.constant 0 : i32
    return %c0_i32, %c0_i32_0 : i32, i32
  }
  func.func @transform_5(%arg0: i32, %arg1: i32) -> (i32, i32) {
    %c0_i32 = arith.constant 0 : i32
    %c0_i32_0 = arith.constant 0 : i32
    %c0_i32_1 = arith.constant 0 : i32
    return %c0_i32, %c0_i32_0 : i32, i32
  }
  func.func @transform_6(%arg0: i32, %arg1: i32) -> (i32, i32) {
    %c0_i32 = arith.constant 0 : i32
    %c0_i32_0 = arith.constant 0 : i32
    %c0_i32_1 = arith.constant 0 : i32
    return %c0_i32, %c0_i32_0 : i32, i32
  }
  func.func @transform_7(%arg0: i32, %arg1: i32) -> (i32, i32) {
    %c0_i32 = arith.constant 0 : i32
    %c0_i32_0 = arith.constant 0 : i32
    %c0_i32_1 = arith.constant 0 : i32
    return %c0_i32, %c0_i32_0 : i32, i32
  }
  func.func @transform_8(%arg0: i32, %arg1: i32) -> (i32, i32) {
    %c0_i32 = arith.constant 0 : i32
    %c0_i32_0 = arith.constant 0 : i32
    %c0_i32_1 = arith.constant 0 : i32
    return %c0_i32, %c0_i32_0 : i32, i32
  }
  func.func @transform_9(%arg0: i32, %arg1: i32) -> (i32, i32) {
    %c0_i32 = arith.constant 0 : i32
    %c0_i32_0 = arith.constant 0 : i32
    %c0_i32_1 = arith.constant 0 : i32
    return %c0_i32, %c0_i32_0 : i32, i32
  }
  func.func @transform_10(%arg0: i32, %arg1: i32) -> (i32, i32) {
    %c0_i32 = arith.constant 0 : i32
    %c0_i32_0 = arith.constant 0 : i32
    %c0_i32_1 = arith.constant 0 : i32
    return %c0_i32, %c0_i32_0 : i32, i32
  }
  func.func @transform_11(%arg0: i32, %arg1: i32) -> (i32, i32, i32) {
    %c0_i32 = arith.constant 0 : i32
    %c0_i32_0 = arith.constant 0 : i32
    return %arg0, %arg1, %c0_i32 : i32, i32, i32
  }
}

module attributes {stable_mosaic.version = 11 : i64} {
  func.func @adaptive_block_kernel(%arg0: i32, %arg1: i32, %arg2: memref<1x8x32xf32, #tpu.memory_space<vmem>>, %arg3: memref<1x8x32xbf16, #tpu.memory_space<vmem>>, %arg4: memref<32x32xbf16, #tpu.memory_space<vmem>>, %arg5: memref<1x32xf32, #tpu.memory_space<vmem>>, %arg6: memref<32x64xbf16, #tpu.memory_space<vmem>>, %arg7: memref<1x64xf32, #tpu.memory_space<vmem>>, %arg8: memref<32x32xbf16, #tpu.memory_space<vmem>>, %arg9: memref<32x128xbf16, #tpu.memory_space<vmem>>, %arg10: memref<1x128xf32, #tpu.memory_space<vmem>>, %arg11: memref<128x32xbf16, #tpu.memory_space<vmem>>, %arg12: memref<1x32xf32, #tpu.memory_space<vmem>>, %arg13: memref<1x8x32xf32, #tpu.memory_space<vmem>>, %arg14: memref<8x32xbf16, #tpu.memory_space<vmem>>, %arg15: memref<8x32xbf16, #tpu.memory_space<vmem>>, %arg16: memref<8x32xbf16, #tpu.memory_space<vmem>>) attributes {dimension_semantics = [#tpu.dimension_semantics<parallel>, #tpu.dimension_semantics<arbitrary>], iteration_bounds = array<i64: 2, 1>, scalar_prefetch = 0 : i64, scratch_operands = 3 : i64, tpu.core_type = #tpu.core_type<tc>, window_params = [{transform_indices = @transform_0, window_bounds = array<i64: 1, 8, 32>}, {transform_indices = @transform_1, window_bounds = array<i64: 1, 8, 32>}, {pipeline_mode = #tpu.pipeline_mode<synchronous>, transform_indices = @transform_2, window_bounds = array<i64: 32, 32>}, {pipeline_mode = #tpu.pipeline_mode<synchronous>, transform_indices = @transform_3, window_bounds = array<i64: 1, 32>}, {pipeline_mode = #tpu.pipeline_mode<synchronous>, transform_indices = @transform_4, window_bounds = array<i64: 32, 64>}, {pipeline_mode = #tpu.pipeline_mode<synchronous>, transform_indices = @transform_5, window_bounds = array<i64: 1, 64>}, {pipeline_mode = #tpu.pipeline_mode<synchronous>, transform_indices = @transform_6, window_bounds = array<i64: 32, 32>}, {pipeline_mode = #tpu.pipeline_mode<synchronous>, transform_indices = @transform_7, window_bounds = array<i64: 32, 128>}, {pipeline_mode = #tpu.pipeline_mode<synchronous>, transform_indices = @transform_8, window_bounds = array<i64: 1, 128>}, {pipeline_mode = #tpu.pipeline_mode<synchronous>, transform_indices = @transform_9, window_bounds = array<i64: 128, 32>}, {pipeline_mode = #tpu.pipeline_mode<synchronous>, transform_indices = @transform_10, window_bounds = array<i64: 1, 32>}, {transform_indices = @transform_11, window_bounds = array<i64: 1, 8, 32>}]} {
    %c0_i32 = arith.constant 0 : i32
    %0 = arith.cmpi eq, %arg1, %c0_i32 : i32
    %1 = arith.extui %0 : i1 to i32
    %c0_i32_0 = arith.constant 0 : i32
    %2 = arith.cmpi ne, %1, %c0_i32_0 : i32
    scf.if %2 {
      %c0_75 = arith.constant 0 : index
      %c0_76 = arith.constant 0 : index
      %c0_77 = arith.constant 0 : index
      %166 = vector.load %arg3[%c0_75, %c0_76, %c0_77] : memref<1x8x32xbf16, #tpu.memory_space<vmem>>, vector<1x8x32xbf16>
      %167 = vector.shape_cast %166 : vector<1x8x32xbf16> to vector<8x32xbf16>
      %168 = arith.extf %167 : vector<8x32xbf16> to vector<8x32xf32>
      %cst_78 = arith.constant dense<0.000000e+00> : vector<8xf32>
      %169 = vector.multi_reduction <add>, %168, %cst_78 [1] : vector<8x32xf32> to vector<8xf32>
      %170 = vector.shape_cast %169 : vector<8xf32> to vector<8x1xf32>
      %cst_79 = arith.constant 3.200000e+01 : f32
      %171 = vector.broadcast %cst_79 : f32 to vector<8x1xf32>
      %172 = arith.divf %170, %171 : vector<8x1xf32>
      %173 = vector.broadcast %172 : vector<8x1xf32> to vector<8x32xf32>
      %174 = arith.subf %168, %173 : vector<8x32xf32>
      %175 = arith.mulf %174, %174 : vector<8x32xf32>
      %cst_80 = arith.constant dense<0.000000e+00> : vector<8xf32>
      %176 = vector.multi_reduction <add>, %175, %cst_80 [1] : vector<8x32xf32> to vector<8xf32>
      %177 = vector.shape_cast %176 : vector<8xf32> to vector<8x1xf32>
      %cst_81 = arith.constant 3.200000e+01 : f32
      %178 = vector.broadcast %cst_81 : f32 to vector<8x1xf32>
      %179 = arith.divf %177, %178 : vector<8x1xf32>
      %180 = vector.broadcast %172 : vector<8x1xf32> to vector<8x32xf32>
      %181 = arith.subf %168, %180 : vector<8x32xf32>
      %cst_82 = arith.constant 9.99999974E-6 : f32
      %182 = vector.broadcast %cst_82 : f32 to vector<8x1xf32>
      %183 = arith.addf %179, %182 : vector<8x1xf32>
      %184 = math.rsqrt %183 : vector<8x1xf32>
      %185 = vector.broadcast %184 : vector<8x1xf32> to vector<8x32xf32>
      %186 = arith.mulf %181, %185 : vector<8x32xf32>
      %187 = arith.truncf %186 : vector<8x32xf32> to vector<8x32xbf16>
      %c0_83 = arith.constant 0 : index
      %c0_84 = arith.constant 0 : index
      %188 = vector.load %arg6[%c0_83, %c0_84] : memref<32x64xbf16, #tpu.memory_space<vmem>>, vector<32x64xbf16>
      %cst_85 = arith.constant dense<0.000000e+00> : vector<8x64xf32>
      %189 = tpu.matmul %187, %188, %cst_85 {dimension_numbers = #tpu.dot_dimension_numbers<[1], [0], [0], [1], [0, 0, 1, 1], [], []>} : vector<8x32xbf16>, vector<32x64xbf16>, vector<8x64xf32> -> vector<8x64xf32>
      %c0_86 = arith.constant 0 : index
      %c0_87 = arith.constant 0 : index
      %190 = vector.load %arg7[%c0_86, %c0_87] : memref<1x64xf32, #tpu.memory_space<vmem>>, vector<1x64xf32>
      %191 = vector.shape_cast %190 : vector<1x64xf32> to vector<64xf32>
      %192 = vector.shape_cast %191 : vector<64xf32> to vector<1x64xf32>
      %193 = vector.broadcast %192 : vector<1x64xf32> to vector<8x64xf32>
      %194 = arith.addf %189, %193 : vector<8x64xf32>
      %195 = vector.extract_strided_slice %194 {offsets = [0, 0], sizes = [8, 32], strides = [1, 1]} : vector<8x64xf32> to vector<8x32xf32>
      %196 = arith.truncf %195 : vector<8x32xf32> to vector<8x32xbf16>
      %c0_88 = arith.constant 0 : index
      %c0_89 = arith.constant 0 : index
      %197 = vector.load %arg14[%c0_88, %c0_89] : memref<8x32xbf16, #tpu.memory_space<vmem>>, vector<8x32xbf16>
      tpu.vector_store %arg14[%c0_88, %c0_89], %196 {strides = array<i32>} : memref<8x32xbf16, #tpu.memory_space<vmem>>, vector<8x32xbf16>,
      %198 = vector.extract_strided_slice %194 {offsets = [0, 32], sizes = [8, 32], strides = [1, 1]} : vector<8x64xf32> to vector<8x32xf32>
      %199 = arith.truncf %198 : vector<8x32xf32> to vector<8x32xbf16>
      %c0_90 = arith.constant 0 : index
      %c0_91 = arith.constant 0 : index
      %200 = vector.load %arg15[%c0_90, %c0_91] : memref<8x32xbf16, #tpu.memory_space<vmem>>, vector<8x32xbf16>
      tpu.vector_store %arg15[%c0_90, %c0_91], %199 {strides = array<i32>} : memref<8x32xbf16, #tpu.memory_space<vmem>>, vector<8x32xbf16>,
    } else {
    }
    %c0 = arith.constant 0 : index
    %c0_1 = arith.constant 0 : index
    %c0_2 = arith.constant 0 : index
    %3 = vector.load %arg2[%c0, %c0_1, %c0_2] : memref<1x8x32xf32, #tpu.memory_space<vmem>>, vector<1x8x32xf32>
    %4 = vector.shape_cast %3 : vector<1x8x32xf32> to vector<8x32xf32>
    %cst = arith.constant dense<0.000000e+00> : vector<8xf32>
    %5 = vector.multi_reduction <add>, %4, %cst [1] : vector<8x32xf32> to vector<8xf32>
    %6 = vector.shape_cast %5 : vector<8xf32> to vector<8x1xf32>
    %cst_3 = arith.constant 3.200000e+01 : f32
    %7 = vector.broadcast %cst_3 : f32 to vector<8x1xf32>
    %8 = arith.divf %6, %7 : vector<8x1xf32>
    %9 = vector.broadcast %8 : vector<8x1xf32> to vector<8x32xf32>
    %10 = arith.subf %4, %9 : vector<8x32xf32>
    %11 = arith.mulf %10, %10 : vector<8x32xf32>
    %cst_4 = arith.constant dense<0.000000e+00> : vector<8xf32>
    %12 = vector.multi_reduction <add>, %11, %cst_4 [1] : vector<8x32xf32> to vector<8xf32>
    %13 = vector.shape_cast %12 : vector<8xf32> to vector<8x1xf32>
    %cst_5 = arith.constant 3.200000e+01 : f32
    %14 = vector.broadcast %cst_5 : f32 to vector<8x1xf32>
    %15 = arith.divf %13, %14 : vector<8x1xf32>
    %16 = vector.broadcast %8 : vector<8x1xf32> to vector<8x32xf32>
    %17 = arith.subf %4, %16 : vector<8x32xf32>
    %cst_6 = arith.constant 9.99999974E-6 : f32
    %18 = vector.broadcast %cst_6 : f32 to vector<8x1xf32>
    %19 = arith.addf %15, %18 : vector<8x1xf32>
    %20 = math.rsqrt %19 : vector<8x1xf32>
    %21 = vector.broadcast %20 : vector<8x1xf32> to vector<8x32xf32>
    %22 = arith.mulf %17, %21 : vector<8x32xf32>
    %23 = arith.truncf %22 : vector<8x32xf32> to vector<8x32xbf16>
    %c0_7 = arith.constant 0 : index
    %c0_8 = arith.constant 0 : index
    %24 = vector.load %arg4[%c0_7, %c0_8] : memref<32x32xbf16, #tpu.memory_space<vmem>>, vector<32x32xbf16>
    %cst_9 = arith.constant dense<0.000000e+00> : vector<8x32xf32>
    %25 = tpu.matmul %23, %24, %cst_9 {dimension_numbers = #tpu.dot_dimension_numbers<[1], [0], [0], [1], [0, 0, 1, 1], [], []>} : vector<8x32xbf16>, vector<32x32xbf16>, vector<8x32xf32> -> vector<8x32xf32>
    %c0_10 = arith.constant 0 : index
    %c0_11 = arith.constant 0 : index
    %26 = vector.load %arg5[%c0_10, %c0_11] : memref<1x32xf32, #tpu.memory_space<vmem>>, vector<1x32xf32>
    %27 = vector.shape_cast %26 : vector<1x32xf32> to vector<32xf32>
    %28 = vector.shape_cast %27 : vector<32xf32> to vector<1x32xf32>
    %29 = vector.broadcast %28 : vector<1x32xf32> to vector<8x32xf32>
    %30 = arith.addf %25, %29 : vector<8x32xf32>
    %31 = arith.truncf %30 : vector<8x32xf32> to vector<8x32xbf16>
    %32 = vector.extract_strided_slice %31 {offsets = [0, 0], sizes = [8, 8], strides = [1, 1]} : vector<8x32xbf16> to vector<8x8xbf16>
    %c0_12 = arith.constant 0 : index
    %c0_13 = arith.constant 0 : index
    %33 = vector.load %arg14[%c0_12, %c0_13] : memref<8x32xbf16, #tpu.memory_space<vmem>>, vector<8x8xbf16>
    %c0_14 = arith.constant 0 : index
    %c0_15 = arith.constant 0 : index
    %34 = vector.load %arg15[%c0_14, %c0_15] : memref<8x32xbf16, #tpu.memory_space<vmem>>, vector<8x8xbf16>
    %cst_16 = arith.constant dense<0.000000e+00> : vector<8x8xf32>
    %35 = tpu.matmul %32, %33, %cst_16 {dimension_numbers = #tpu.dot_dimension_numbers<[1], [1], [0], [0], [0, 0, 1, 0], [], []>} : vector<8x8xbf16>, vector<8x8xbf16>, vector<8x8xf32> -> vector<8x8xf32>
    %cst_17 = arith.constant dense<0xFF800000> : vector<8xf32>
    %36 = vector.multi_reduction <maximumf>, %35, %cst_17 [1] : vector<8x8xf32> to vector<8xf32>
    %37 = vector.shape_cast %36 : vector<8xf32> to vector<8x1xf32>
    %38 = vector.broadcast %37 : vector<8x1xf32> to vector<8x8xf32>
    %39 = arith.subf %35, %38 : vector<8x8xf32>
    %40 = arith.truncf %39 : vector<8x8xf32> to vector<8x8xbf16>
    %41 = math.exp %40 : vector<8x8xbf16>
    %42 = arith.extf %41 : vector<8x8xbf16> to vector<8x8xf32>
    %cst_18 = arith.constant dense<0.000000e+00> : vector<8xf32>
    %43 = vector.multi_reduction <add>, %42, %cst_18 [1] : vector<8x8xf32> to vector<8xf32>
    %44 = vector.shape_cast %43 : vector<8xf32> to vector<8x1xf32>
    %45 = tpu.reciprocal %44 {approx = true} : vector<8x1xf32> -> vector<8x1xf32>
    %46 = arith.extf %41 : vector<8x8xbf16> to vector<8x8xf32>
    %47 = vector.broadcast %45 : vector<8x1xf32> to vector<8x8xf32>
    %48 = arith.mulf %46, %47 : vector<8x8xf32>
    %49 = arith.truncf %48 : vector<8x8xf32> to vector<8x8xbf16>
    %cst_19 = arith.constant dense<0.000000e+00> : vector<8x8xf32>
    %50 = tpu.matmul %49, %34, %cst_19 {dimension_numbers = #tpu.dot_dimension_numbers<[1], [0], [0], [1], [0, 0, 1, 1], [], []>} : vector<8x8xbf16>, vector<8x8xbf16>, vector<8x8xf32> -> vector<8x8xf32>
    %51 = arith.truncf %50 : vector<8x8xf32> to vector<8x8xbf16>
    %c0_20 = arith.constant 0 : index
    %c0_21 = arith.constant 0 : index
    %52 = vector.load %arg16[%c0_20, %c0_21] : memref<8x32xbf16, #tpu.memory_space<vmem>>, vector<8x8xbf16>
    tpu.vector_store %arg16[%c0_20, %c0_21], %51 {strides = array<i32>} : memref<8x32xbf16, #tpu.memory_space<vmem>>, vector<8x8xbf16>,
    %53 = vector.extract_strided_slice %31 {offsets = [0, 8], sizes = [8, 8], strides = [1, 1]} : vector<8x32xbf16> to vector<8x8xbf16>
    %c0_22 = arith.constant 0 : index
    %c8 = arith.constant 8 : index
    %54 = vector.load %arg14[%c0_22, %c8] : memref<8x32xbf16, #tpu.memory_space<vmem>>, vector<8x8xbf16>
    %c0_23 = arith.constant 0 : index
    %c8_24 = arith.constant 8 : index
    %55 = vector.load %arg15[%c0_23, %c8_24] : memref<8x32xbf16, #tpu.memory_space<vmem>>, vector<8x8xbf16>
    %cst_25 = arith.constant dense<0.000000e+00> : vector<8x8xf32>
    %56 = tpu.matmul %53, %54, %cst_25 {dimension_numbers = #tpu.dot_dimension_numbers<[1], [1], [0], [0], [0, 0, 1, 0], [], []>} : vector<8x8xbf16>, vector<8x8xbf16>, vector<8x8xf32> -> vector<8x8xf32>
    %cst_26 = arith.constant dense<0xFF800000> : vector<8xf32>
    %57 = vector.multi_reduction <maximumf>, %56, %cst_26 [1] : vector<8x8xf32> to vector<8xf32>
    %58 = vector.shape_cast %57 : vector<8xf32> to vector<8x1xf32>
    %59 = vector.broadcast %58 : vector<8x1xf32> to vector<8x8xf32>
    %60 = arith.subf %56, %59 : vector<8x8xf32>
    %61 = arith.truncf %60 : vector<8x8xf32> to vector<8x8xbf16>
    %62 = math.exp %61 : vector<8x8xbf16>
    %63 = arith.extf %62 : vector<8x8xbf16> to vector<8x8xf32>
    %cst_27 = arith.constant dense<0.000000e+00> : vector<8xf32>
    %64 = vector.multi_reduction <add>, %63, %cst_27 [1] : vector<8x8xf32> to vector<8xf32>
    %65 = vector.shape_cast %64 : vector<8xf32> to vector<8x1xf32>
    %66 = tpu.reciprocal %65 {approx = true} : vector<8x1xf32> -> vector<8x1xf32>
    %67 = arith.extf %62 : vector<8x8xbf16> to vector<8x8xf32>
    %68 = vector.broadcast %66 : vector<8x1xf32> to vector<8x8xf32>
    %69 = arith.mulf %67, %68 : vector<8x8xf32>
    %70 = arith.truncf %69 : vector<8x8xf32> to vector<8x8xbf16>
    %cst_28 = arith.constant dense<0.000000e+00> : vector<8x8xf32>
    %71 = tpu.matmul %70, %55, %cst_28 {dimension_numbers = #tpu.dot_dimension_numbers<[1], [0], [0], [1], [0, 0, 1, 1], [], []>} : vector<8x8xbf16>, vector<8x8xbf16>, vector<8x8xf32> -> vector<8x8xf32>
    %72 = arith.truncf %71 : vector<8x8xf32> to vector<8x8xbf16>
    %c0_29 = arith.constant 0 : index
    %c8_30 = arith.constant 8 : index
    %73 = vector.load %arg16[%c0_29, %c8_30] : memref<8x32xbf16, #tpu.memory_space<vmem>>, vector<8x8xbf16>
    tpu.vector_store %arg16[%c0_29, %c8_30], %72 {strides = array<i32>} : memref<8x32xbf16, #tpu.memory_space<vmem>>, vector<8x8xbf16>,
    %74 = vector.extract_strided_slice %31 {offsets = [0, 16], sizes = [8, 8], strides = [1, 1]} : vector<8x32xbf16> to vector<8x8xbf16>
    %c0_31 = arith.constant 0 : index
    %c16 = arith.constant 16 : index
    %75 = vector.load %arg14[%c0_31, %c16] : memref<8x32xbf16, #tpu.memory_space<vmem>>, vector<8x8xbf16>
    %c0_32 = arith.constant 0 : index
    %c16_33 = arith.constant 16 : index
    %76 = vector.load %arg15[%c0_32, %c16_33] : memref<8x32xbf16, #tpu.memory_space<vmem>>, vector<8x8xbf16>
    %cst_34 = arith.constant dense<0.000000e+00> : vector<8x8xf32>
    %77 = tpu.matmul %74, %75, %cst_34 {dimension_numbers = #tpu.dot_dimension_numbers<[1], [1], [0], [0], [0, 0, 1, 0], [], []>} : vector<8x8xbf16>, vector<8x8xbf16>, vector<8x8xf32> -> vector<8x8xf32>
    %cst_35 = arith.constant dense<0xFF800000> : vector<8xf32>
    %78 = vector.multi_reduction <maximumf>, %77, %cst_35 [1] : vector<8x8xf32> to vector<8xf32>
    %79 = vector.shape_cast %78 : vector<8xf32> to vector<8x1xf32>
    %80 = vector.broadcast %79 : vector<8x1xf32> to vector<8x8xf32>
    %81 = arith.subf %77, %80 : vector<8x8xf32>
    %82 = arith.truncf %81 : vector<8x8xf32> to vector<8x8xbf16>
    %83 = math.exp %82 : vector<8x8xbf16>
    %84 = arith.extf %83 : vector<8x8xbf16> to vector<8x8xf32>
    %cst_36 = arith.constant dense<0.000000e+00> : vector<8xf32>
    %85 = vector.multi_reduction <add>, %84, %cst_36 [1] : vector<8x8xf32> to vector<8xf32>
    %86 = vector.shape_cast %85 : vector<8xf32> to vector<8x1xf32>
    %87 = tpu.reciprocal %86 {approx = true} : vector<8x1xf32> -> vector<8x1xf32>
    %88 = arith.extf %83 : vector<8x8xbf16> to vector<8x8xf32>
    %89 = vector.broadcast %87 : vector<8x1xf32> to vector<8x8xf32>
    %90 = arith.mulf %88, %89 : vector<8x8xf32>
    %91 = arith.truncf %90 : vector<8x8xf32> to vector<8x8xbf16>
    %cst_37 = arith.constant dense<0.000000e+00> : vector<8x8xf32>
    %92 = tpu.matmul %91, %76, %cst_37 {dimension_numbers = #tpu.dot_dimension_numbers<[1], [0], [0], [1], [0, 0, 1, 1], [], []>} : vector<8x8xbf16>, vector<8x8xbf16>, vector<8x8xf32> -> vector<8x8xf32>
    %93 = arith.truncf %92 : vector<8x8xf32> to vector<8x8xbf16>
    %c0_38 = arith.constant 0 : index
    %c16_39 = arith.constant 16 : index
    %94 = vector.load %arg16[%c0_38, %c16_39] : memref<8x32xbf16, #tpu.memory_space<vmem>>, vector<8x8xbf16>
    tpu.vector_store %arg16[%c0_38, %c16_39], %93 {strides = array<i32>} : memref<8x32xbf16, #tpu.memory_space<vmem>>, vector<8x8xbf16>,
    %95 = vector.extract_strided_slice %31 {offsets = [0, 24], sizes = [8, 8], strides = [1, 1]} : vector<8x32xbf16> to vector<8x8xbf16>
    %c0_40 = arith.constant 0 : index
    %c24 = arith.constant 24 : index
    %96 = vector.load %arg14[%c0_40, %c24] : memref<8x32xbf16, #tpu.memory_space<vmem>>, vector<8x8xbf16>
    %c0_41 = arith.constant 0 : index
    %c24_42 = arith.constant 24 : index
    %97 = vector.load %arg15[%c0_41, %c24_42] : memref<8x32xbf16, #tpu.memory_space<vmem>>, vector<8x8xbf16>
    %cst_43 = arith.constant dense<0.000000e+00> : vector<8x8xf32>
    %98 = tpu.matmul %95, %96, %cst_43 {dimension_numbers = #tpu.dot_dimension_numbers<[1], [1], [0], [0], [0, 0, 1, 0], [], []>} : vector<8x8xbf16>, vector<8x8xbf16>, vector<8x8xf32> -> vector<8x8xf32>
    %cst_44 = arith.constant dense<0xFF800000> : vector<8xf32>
    %99 = vector.multi_reduction <maximumf>, %98, %cst_44 [1] : vector<8x8xf32> to vector<8xf32>
    %100 = vector.shape_cast %99 : vector<8xf32> to vector<8x1xf32>
    %101 = vector.broadcast %100 : vector<8x1xf32> to vector<8x8xf32>
    %102 = arith.subf %98, %101 : vector<8x8xf32>
    %103 = arith.truncf %102 : vector<8x8xf32> to vector<8x8xbf16>
    %104 = math.exp %103 : vector<8x8xbf16>
    %105 = arith.extf %104 : vector<8x8xbf16> to vector<8x8xf32>
    %cst_45 = arith.constant dense<0.000000e+00> : vector<8xf32>
    %106 = vector.multi_reduction <add>, %105, %cst_45 [1] : vector<8x8xf32> to vector<8xf32>
    %107 = vector.shape_cast %106 : vector<8xf32> to vector<8x1xf32>
    %108 = tpu.reciprocal %107 {approx = true} : vector<8x1xf32> -> vector<8x1xf32>
    %109 = arith.extf %104 : vector<8x8xbf16> to vector<8x8xf32>
    %110 = vector.broadcast %108 : vector<8x1xf32> to vector<8x8xf32>
    %111 = arith.mulf %109, %110 : vector<8x8xf32>
    %112 = arith.truncf %111 : vector<8x8xf32> to vector<8x8xbf16>
    %cst_46 = arith.constant dense<0.000000e+00> : vector<8x8xf32>
    %113 = tpu.matmul %112, %97, %cst_46 {dimension_numbers = #tpu.dot_dimension_numbers<[1], [0], [0], [1], [0, 0, 1, 1], [], []>} : vector<8x8xbf16>, vector<8x8xbf16>, vector<8x8xf32> -> vector<8x8xf32>
    %114 = arith.truncf %113 : vector<8x8xf32> to vector<8x8xbf16>
    %c0_47 = arith.constant 0 : index
    %c24_48 = arith.constant 24 : index
    %115 = vector.load %arg16[%c0_47, %c24_48] : memref<8x32xbf16, #tpu.memory_space<vmem>>, vector<8x8xbf16>
    tpu.vector_store %arg16[%c0_47, %c24_48], %114 {strides = array<i32>} : memref<8x32xbf16, #tpu.memory_space<vmem>>, vector<8x8xbf16>,
    %c0_49 = arith.constant 0 : index
    %c0_50 = arith.constant 0 : index
    %116 = vector.load %arg16[%c0_49, %c0_50] : memref<8x32xbf16, #tpu.memory_space<vmem>>, vector<8x32xbf16>
    %c0_51 = arith.constant 0 : index
    %c0_52 = arith.constant 0 : index
    %117 = vector.load %arg8[%c0_51, %c0_52] : memref<32x32xbf16, #tpu.memory_space<vmem>>, vector<32x32xbf16>
    %cst_53 = arith.constant dense<0.000000e+00> : vector<8x32xf32>
    %118 = tpu.matmul %116, %117, %cst_53 {dimension_numbers = #tpu.dot_dimension_numbers<[1], [0], [0], [1], [0, 0, 1, 1], [], []>} : vector<8x32xbf16>, vector<32x32xbf16>, vector<8x32xf32> -> vector<8x32xf32>
    %119 = arith.addf %4, %118 : vector<8x32xf32>
    %cst_54 = arith.constant dense<0.000000e+00> : vector<8xf32>
    %120 = vector.multi_reduction <add>, %119, %cst_54 [1] : vector<8x32xf32> to vector<8xf32>
    %121 = vector.shape_cast %120 : vector<8xf32> to vector<8x1xf32>
    %cst_55 = arith.constant 3.200000e+01 : f32
    %122 = vector.broadcast %cst_55 : f32 to vector<8x1xf32>
    %123 = arith.divf %121, %122 : vector<8x1xf32>
    %124 = vector.broadcast %123 : vector<8x1xf32> to vector<8x32xf32>
    %125 = arith.subf %119, %124 : vector<8x32xf32>
    %126 = arith.mulf %125, %125 : vector<8x32xf32>
    %cst_56 = arith.constant dense<0.000000e+00> : vector<8xf32>
    %127 = vector.multi_reduction <add>, %126, %cst_56 [1] : vector<8x32xf32> to vector<8xf32>
    %128 = vector.shape_cast %127 : vector<8xf32> to vector<8x1xf32>
    %cst_57 = arith.constant 3.200000e+01 : f32
    %129 = vector.broadcast %cst_57 : f32 to vector<8x1xf32>
    %130 = arith.divf %128, %129 : vector<8x1xf32>
    %131 = vector.broadcast %123 : vector<8x1xf32> to vector<8x32xf32>
    %132 = arith.subf %119, %131 : vector<8x32xf32>
    %cst_58 = arith.constant 9.99999974E-6 : f32
    %133 = vector.broadcast %cst_58 : f32 to vector<8x1xf32>
    %134 = arith.addf %130, %133 : vector<8x1xf32>
    %135 = math.rsqrt %134 : vector<8x1xf32>
    %136 = vector.broadcast %135 : vector<8x1xf32> to vector<8x32xf32>
    %137 = arith.mulf %132, %136 : vector<8x32xf32>
    %138 = arith.truncf %137 : vector<8x32xf32> to vector<8x32xbf16>
    %c0_59 = arith.constant 0 : index
    %c0_60 = arith.constant 0 : index
    %139 = vector.load %arg9[%c0_59, %c0_60] : memref<32x128xbf16, #tpu.memory_space<vmem>>, vector<32x128xbf16>
    %cst_61 = arith.constant dense<0.000000e+00> : vector<8x128xf32>
    %140 = tpu.matmul %138, %139, %cst_61 {dimension_numbers = #tpu.dot_dimension_numbers<[1], [0], [0], [1], [0, 0, 1, 1], [], []>} : vector<8x32xbf16>, vector<32x128xbf16>, vector<8x128xf32> -> vector<8x128xf32>
    %c0_62 = arith.constant 0 : index
    %c0_63 = arith.constant 0 : index
    %141 = vector.load %arg10[%c0_62, %c0_63] : memref<1x128xf32, #tpu.memory_space<vmem>>, vector<1x128xf32>
    %142 = vector.shape_cast %141 : vector<1x128xf32> to vector<128xf32>
    %143 = vector.shape_cast %142 : vector<128xf32> to vector<1x128xf32>
    %144 = vector.broadcast %143 : vector<1x128xf32> to vector<8x128xf32>
    %145 = arith.addf %140, %144 : vector<8x128xf32>
    %cst_64 = arith.constant 5.000000e-01 : f32
    %146 = vector.broadcast %cst_64 : f32 to vector<8x128xf32>
    %147 = arith.mulf %146, %145 : vector<8x128xf32>
    %cst_65 = arith.constant 0.707106769 : f32
    %148 = vector.broadcast %cst_65 : f32 to vector<8x128xf32>
    %149 = arith.mulf %145, %148 : vector<8x128xf32>
    %150 = math.erf %149 : vector<8x128xf32>
    %cst_66 = arith.constant 1.000000e+00 : f32
    %151 = vector.broadcast %cst_66 : f32 to vector<8x128xf32>
    %152 = arith.addf %151, %150 : vector<8x128xf32>
    %153 = arith.mulf %147, %152 : vector<8x128xf32>
    %154 = arith.truncf %153 : vector<8x128xf32> to vector<8x128xbf16>
    %c0_67 = arith.constant 0 : index
    %c0_68 = arith.constant 0 : index
    %155 = vector.load %arg11[%c0_67, %c0_68] : memref<128x32xbf16, #tpu.memory_space<vmem>>, vector<128x32xbf16>
    %cst_69 = arith.constant dense<0.000000e+00> : vector<8x32xf32>
    %156 = tpu.matmul %154, %155, %cst_69 {dimension_numbers = #tpu.dot_dimension_numbers<[1], [0], [0], [1], [0, 0, 1, 1], [], []>} : vector<8x128xbf16>, vector<128x32xbf16>, vector<8x32xf32> -> vector<8x32xf32>
    %c0_70 = arith.constant 0 : index
    %c0_71 = arith.constant 0 : index
    %157 = vector.load %arg12[%c0_70, %c0_71] : memref<1x32xf32, #tpu.memory_space<vmem>>, vector<1x32xf32>
    %158 = vector.shape_cast %157 : vector<1x32xf32> to vector<32xf32>
    %159 = vector.shape_cast %158 : vector<32xf32> to vector<1x32xf32>
    %160 = vector.broadcast %159 : vector<1x32xf32> to vector<8x32xf32>
    %161 = arith.addf %156, %160 : vector<8x32xf32>
    %162 = arith.addf %119, %161 : vector<8x32xf32>
    %c0_72 = arith.constant 0 : index
    %c0_73 = arith.constant 0 : index
    %c0_74 = arith.constant 0 : index
    %163 = vector.load %arg13[%c0_72, %c0_73, %c0_74] : memref<1x8x32xf32, #tpu.memory_space<vmem>>, vector<1x8x32xf32>
    %164 = vector.shape_cast %163 : vector<1x8x32xf32> to vector<8x32xf32>
    %165 = vector.shape_cast %162 : vector<8x32xf32> to vector<1x8x32xf32>
    tpu.vector_store %arg13[%c0_72, %c0_73, %c0_74], %165 {strides = array<i32>} : memref<1x8x32xf32, #tpu.memory_space<vmem>>, vector<1x8x32xf32>,
    return
  }
  func.func @transform_0(%arg0: i32, %arg1: i32) -> (i32, i32, i32) {
    %c0_i32 = arith.constant 0 : i32
    %c0_i32_0 = arith.constant 0 : i32
    return %arg0, %arg1, %c0_i32 : i32, i32, i32
  }
  func.func @transform_1(%arg0: i32, %arg1: i32) -> (i32, i32, i32) {
    %c0_i32 = arith.constant 0 : i32
    %c0_i32_0 = arith.constant 0 : i32
    %c0_i32_1 = arith.constant 0 : i32
    return %arg0, %c0_i32, %c0_i32_0 : i32, i32, i32
  }
  func.func @transform_2(%arg0: i32, %arg1: i32) -> (i32, i32) {
    %c0_i32 = arith.constant 0 : i32
    %c0_i32_0 = arith.constant 0 : i32
    %c0_i32_1 = arith.constant 0 : i32
    return %c0_i32, %c0_i32_0 : i32, i32
  }
  func.func @transform_3(%arg0: i32, %arg1: i32) -> (i32, i32) {
    %c0_i32 = arith.constant 0 : i32
    %c0_i32_0 = arith.constant 0 : i32
    %c0_i32_1 = arith.constant 0 : i32
    return %c0_i32, %c0_i32_0 : i32, i32
  }
  func.func @transform_4(%arg0: i32, %arg1: i32) -> (i32, i32) {
    %c0_i32 = arith.constant 0 : i32
    %c0_i32_0 = arith.constant 0 : i32
    %c0_i32_1 = arith.constant 0 : i32
    return %c0_i32, %c0_i32_0 : i32, i32
  }
  func.func @transform_5(%arg0: i32, %arg1: i32) -> (i32, i32) {
    %c0_i32 = arith.constant 0 : i32
    %c0_i32_0 = arith.constant 0 : i32
    %c0_i32_1 = arith.constant 0 : i32
    return %c0_i32, %c0_i32_0 : i32, i32
  }
  func.func @transform_6(%arg0: i32, %arg1: i32) -> (i32, i32) {
    %c0_i32 = arith.constant 0 : i32
    %c0_i32_0 = arith.constant 0 : i32
    %c0_i32_1 = arith.constant 0 : i32
    return %c0_i32, %c0_i32_0 : i32, i32
  }
  func.func @transform_7(%arg0: i32, %arg1: i32) -> (i32, i32) {
    %c0_i32 = arith.constant 0 : i32
    %c0_i32_0 = arith.constant 0 : i32
    %c0_i32_1 = arith.constant 0 : i32
    return %c0_i32, %c0_i32_0 : i32, i32
  }
  func.func @transform_8(%arg0: i32, %arg1: i32) -> (i32, i32) {
    %c0_i32 = arith.constant 0 : i32
    %c0_i32_0 = arith.constant 0 : i32
    %c0_i32_1 = arith.constant 0 : i32
    return %c0_i32, %c0_i32_0 : i32, i32
  }
  func.func @transform_9(%arg0: i32, %arg1: i32) -> (i32, i32) {
    %c0_i32 = arith.constant 0 : i32
    %c0_i32_0 = arith.constant 0 : i32
    %c0_i32_1 = arith.constant 0 : i32
    return %c0_i32, %c0_i32_0 : i32, i32
  }
  func.func @transform_10(%arg0: i32, %arg1: i32) -> (i32, i32) {
    %c0_i32 = arith.constant 0 : i32
    %c0_i32_0 = arith.constant 0 : i32
    %c0_i32_1 = arith.constant 0 : i32
    return %c0_i32, %c0_i32_0 : i32, i32
  }
  func.func @transform_11(%arg0: i32, %arg1: i32) -> (i32, i32, i32) {
    %c0_i32 = arith.constant 0 : i32
    %c0_i32_0 = arith.constant 0 : i32
    return %arg0, %arg1, %c0_i32 : i32, i32, i32
  }
}

</mosaic_0001>

<bundles_post_ra>
// kernel: tpu_custom_call.1
= control target key start
LH: loop header
LB: loop body
LE: loop exit
PB: predicated region body
PF: predicated region fallthrough
CT: control target
= control target key end

     0   :  { %s1857_s0 = inlined_call_operand.vmem [shape: f32[2,8,32], index: 0, kind: input, shape index: {}]   ;;  %s1858_s1 = inlined_call_operand.hbm [shape: bf16[2,8,32], index: 1, kind: input, shape index: {}]   ;;  %s1859_s2 = inlined_call_operand.vmem [shape: bf16[32,32], index: 2, kind: input, shape index: {}]   ;;  %s1860_s3 = inlined_call_operand.vmem [shape: f32[1,32], index: 3, kind: input, shape index: {}]   ;;  %s1861_s4 = inlined_call_operand.vmem [shape: bf16[32,64], index: 4, kind: input, shape index: {}]   ;;  %s1862_s5 = inlined_call_operand.vmem [shape: f32[1,64], index: 5, kind: input, shape index: {}]   ;;  %s1863_s6 = inlined_call_operand.vmem [shape: bf16[32,32], index: 6, kind: input, shape index: {}]   ;;  %s1864_s7 = inlined_call_operand.vmem [shape: bf16[32,128], index: 7, kind: input, shape index: {}]   ;;  %s1865_s8 = inlined_call_operand.vmem [shape: f32[1,128], index: 8, kind: input, shape index: {}]   ;;  %s1866_s9 = inlined_call_operand.vmem [shape: bf16[128,32], index: 9, kind: input, shape index: {}]   ;;  %s1867_s10 = inlined_call_operand.vmem [shape: f32[1,32], index: 10, kind: input, shape index: {}]   ;;  %s1868_s11 = inlined_call_operand.hbm [shape: f32[2,8,32], index: 11, kind: output, shape index: {}]  }
   0x1   :  { %1874 = sst [smem:[#allocation14_spill]] %s1857_s0 }
   0x2   :  { %1875 = sst [smem:[#allocation15_spill]] %s1868_s11 }
   0x3   :  { %16 = vsyncpa [#allocation6], 0 }
   0x4   :  { %18 = vsyncpa [#allocation6 + $0x1], 0 }
   0x5   :  { %19 = vsyncpa [#allocation7], 0 }
   0x6   :  { %21 = vsyncpa [#allocation7 + $0x1], 0  ;;  %s1607_s17 = smov 0   ;;  %s1609_s18 = smov 0  }
   0x7   :  { %s1611_s19 = smov 0   ;;  %s1613_s20 = smov 0  }
   0x8   :  { %s1615_s21 = smov 0   ;;  %s1617_s22 = smov 0  }
   0x9 LB: > { %1876 = sst [smem:[#allocation11_spill]] %s1517_s17  ;;  %s1218_s23 = sadd.s32 4294967295, %s1537_s22   ;;  %s1537_s22 = sphi %s1617_s22, %s27_s22   ;;  %s1533_s21 = sphi %s1615_s21, %s1892_s21   ;;  %s1529_s20 = sphi %s1613_s20, %s1891_s20   ;;  %s1525_s19 = sphi %s1611_s19, %s1890_s19   ;;  %s1521_s18 = sphi %s1609_s18, %s1889_s18   ;;  %s1517_s17 = sphi %s1607_s17, %s1888_s17  }
   0xa   : > { %s1219_s24 = sadd.s32 4294967294, %s1537_s22   ;;  %s39_s25 = sadd.s32 1, %s1533_s21 }
   0xb   : > { %s74_s26 = sadd.s32 1, %s1525_s19  ;;  %p41_p0 = scmp.ge.s32.totalorder %s39_s25, 2 }
   0xc   : > { %p81_p1 = scmp.ne.s32.totalorder %s1525_s19, %s1521_s18  ;;  %p82_p2 = scmp.eq.s32.totalorder %s1537_s22, 0 }
   0xd   : > { %p87_p3 = scmp.ne.s32.totalorder %s1521_s18, %s1517_s17  ;;  %s1894_s25 = smov (%p41_p0, %s39_s25), 0 }
   0xe   : > { %1877 = sst [smem:[#allocation12_spill]] %s1894_s25  ;;  %p1648_p4 = por %p82_p2, %p81_p1 }
   0xf   : > { %p88_p5 = scmp.eq.s32.totalorder %s1218_s23, 0  ;;  %s71_s28 = ssub.s32 %s1533_s21, %s1894_s25 }
  0x10   : > { %p302_p6 = scmp.eq.s32.totalorder %s1218_s23, 1  ;;  %p72_p7 = scmp.eq.s32.totalorder %s71_s28, 0 }
  0x11   : > { %p1654_p8 = por %p88_p5, %p87_p3  ;;  %p308_p10 = scmp.eq.s32.totalorder %s1219_s24, 1 }
  0x12   : > { %p1658_p9 = por %p302_p6, %p81_p1  ;;  %p1221_p12 = scmp.ge.s32.totalorder %s1537_s22, 2 }
  0x13   : > { %s1663_s12 = scalar_select %p72_p7, %s1525_s19, %s74_s26  }
  0x14   : > { %s1880_s30 = scalar_select %p1658_p9, 1, 0 }
  0x15   : > { %p1665_p11 = por %p308_p10, %p87_p3  ;;  %p1337_p13 = scmp.lt.s32.totalorder %s1537_s22, 2 }
  0x16   : > { %1881 = sst [smem:[#allocation13_spill]] %s1880_s30  ;;  %s365_s14 = sand.u32 1, %s1525_s19  }
  0x17   : > { %s1222_s15 = sshll.u32 %s365_s14, 2  ;;  %s1223_s16 = sshll.u32 %s1533_s21, 2 }
  0x18   : > { %s373_s25 = scalar_lea.hbm %s1858_s1, %s1223_s16  ;;  %s369_s17 = scalar_lea.vmem [#allocation5], %s1222_s15 }
  0x19   : > { %s377_s30 = sshll.u32 %s369_s17, 4  ;;  %s375_s11 = sshll.u32 %s373_s25, 4  ;;  %s378_s30 = int_to_ptr.vmem [resolvable:$true] %s377_s30  ;;  %s376_s11 = int_to_ptr.hbm [resolvable:$true] %s375_s11 }
  0x1a   : > { %p1330_p0 = pnand %p1337_p13, %p1648_p4  ;;  %p1224_p1 = scmp.ge.s32.totalorder %s1537_s22, 1 }
  0x1b   : > { %p382_p2 = scmp.lt.s32.totalorder %s1537_s22, 3  ;;  %s366_s24 = scalar_lea.sflag [#allocation6], %s365_s14 }
  0x1c   : > { %1332 = dma.hbm_to_vmem [thread:$0]  (!%p1330_p0), %s376_s11, 64, %s378_s30, %s366_s24  }
  0x1d   : > { %p383_p3 = pnand %p1224_p1, %p382_p2 }
  0x1e   : > { %s1681_s26 = sand.u32 (!%p383_p3), 1, %s1521_s18  }
  0x1f   : > { %386 = sbr.rel (%p383_p3) target bundleno = 1978 (0x7ba), region = 64  ;;  %s1225_s16 = sshll.u32 (!%p383_p3), %s1681_s26, 2 }
  0x20   : > { %s389_s15 = scalar_lea.sflag (!%p383_p3), [#allocation6], %s1681_s26  ;;  %s392_s17 = scalar_lea.vmem (!%p383_p3), [#allocation5], %s1225_s16 }
  0x24   : > { %1508 = dma.done.wait (%p1654_p8), %s389_s15, 64  }
  0x25   : > { %1510 = vsyncadd (%p1654_p8), %s389_s15, 4294967232  ;;  %p439_p4 = scmp.lt.s32.totalorder %s1529_s20, 1  ;;  %v451_v0 = vld [vmem:[%s392_s17] sm:$0xf]  ;;  %vm453_vm0 = vcmask 261120   ;;  %s1883_s0 = sld [smem:[#allocation14_spill]] }
  0x26   : > { %v452_v1 = vunpack.c.l.bf16 %v451_v0  ;;  %v1539_v5 = vmov 32.0   ;;  %v1310_v22 = vld [vmem:[%s1861_s4 + $0x8] sm:$0xff]  ;;  %v1309_v23 = vld [vmem:[%s1861_s4] sm:$0xff]  ;;  %vm521_vm8 = vcmask 257024   ;;  %vm599_vm9 = vcmask 64512   ;;  %s1540_s29 = smov 112  }
  0x27   : > { %s440_s11 = scalar_select %p439_p4, %s1529_s20, 1  ;;  %1399 = vrcp.f32 %v1539_v5  ;;  %513 = vmatpush.bf16.msra.mxu0 %v1310_v22  ;;  %v1312_v24 = vld [vmem:[%s1859_s2 + $0x8] sm:$0xff]  ;;  %v1311_v25 = vld [vmem:[%s1859_s2] sm:$0xff]  ;;  %vm638_vm10 = vcmask 1043456   ;;  %vm656_vm11 = vcmask 60416   ;;  %vm734_vm12 = vcmask 126016  }
  0x28   : > { %v454_v2 = vsel %vm453_vm0, %v452_v1, 0.0  ;;  %589 = vmatpush.bf16.msra.mxu1 %v1312_v24  ;;  %v1395_v50 = vld [vmem:[%s1862_s5] ss:$0 sm:$0xff]  ;;  %s1541_s23 = smov 120   ;;  %s1542_s28 = smov 104   ;;  %vm809_vm13 = vcmask 191616  }
  0x29   : > { %s1227_s25 = sshll.u32 %s440_s11, 3  ;;  %455 = vadd.xlane.f32.xlu0 %v454_v2  ;;  %v1396_v54 = vld [vmem:[%s1860_s3] ss:$0 sm:$0xff]  ;;  %s1543_s24 = smov 96   ;;  %vm884_vm14 = vcmask 257216  }
  0x2a   : > { %s1544_s16 = smov 16   ;;  %s1545_s15 = smov 8  }
  0x2b   : > { %s445_s14 = scalar_lea.vmem %s1883_s0, %s1227_s25  ;;  %514 = vmatpush.bf16.msra.mxu0 %v1309_v23  ;;  %s1546_s17 = smov 24  }
  0x2c   : > { %v1695_v3 = vld [vmem:[%s445_s14] sm:$0xff]  ;;  %590 = vmatpush.bf16.msra.mxu1 %v1311_v25  ;;  %s1226_s27 = sshll.u32 %s1681_s26, 3  ;;  %s1306_s30 = sshll.u32 %s1529_s20, 3 }
  0x2d   : > { %v530_v4 = vsel %vm453_vm0, %v1695_v3, 0.0  ;;  %v1400_v6 = vpop.eup %1399  ;;  %s1108_s20 = scalar_lea.sflag [#allocation7], %s1681_s26 }
  0x2e   : > { %v458_v7 = vmul.f32 32.0, %v1400_v6  ;;  %vm462_vm1 = vweird.f32 %v1400_v6 }
  0x30   : > { %v459_v8 = vsub.f32 1.0, %v458_v7 }
  0x31   : > { %531 = vadd.xlane.f32.xlu0 %v530_v4 }
  0x32   : > { %v460_v9 = vmul.f32 %v1400_v6, %v459_v8 }
  0x34   : > { %v461_v10 = vadd.f32 %v1400_v6, %v460_v9 }
  0x36   : > { %v1699_v11 = vsel %vm462_vm1, %v1400_v6, %v461_v10 }
  0x9c   : > { %v456_v12 = vpop.xlane.xlu0 %455 }
  0x9d   : > { %v464_v13 = vmul.f32 %v1699_v11, %v456_v12 }
  0x9f   : > { %v465_v14 = vsub.f32 %v452_v1, %v464_v13 }
  0xa1   : > { %v466_v15 = vmul.f32 %v465_v14, %v465_v14 }
  0xa3   : > { %v467_v16 = vsel %vm453_vm0, %v466_v15, 0.0 }
  0xa4   : > { %468 = vadd.xlane.f32.xlu1 %v467_v16  ;;  %v532_v17 = vpop.xlane.xlu0 %531 }
  0xa5   : > { %v540_v18 = vmul.f32 %v532_v17, %v1699_v11 }
  0xa7   : > { %v541_v19 = vsub.f32 %v1695_v3, %v540_v18 }
  0xa9   : > { %v542_v20 = vmul.f32 %v541_v19, %v541_v19 }
  0xab   : > { %v543_v21 = vsel %vm453_vm0, %v542_v20, 0.0 }
  0xac   : > { %544 = vadd.xlane.f32.xlu1 %v543_v21 }
 0x117   : > { %v469_v26 = vpop.xlane.xlu1 %468 }
 0x118   : > { %v470_v27 = vmul.f32 %v469_v26, %v1699_v11 }
 0x11a   : > { %v471_v28 = vadd.f32 1e-05, %v470_v27 }
 0x11c   : > { %1401 = vrsqrt.f32 %v471_v28  ;;  %vm478_vm3 = vweird.f32 %v471_v28 }
 0x11f   : > { %v545_v29 = vpop.xlane.xlu1 %544 }
 0x120   : > { %v546_v30 = vmul.f32 %v545_v29, %v1699_v11 }
 0x122   : > { %v1402_v31 = vpop.eup %1401  ;;  %v547_v32 = vadd.f32 1e-05, %v546_v30 }
 0x123   : > { %v473_v33 = vmul.f32 %v1402_v31, %v471_v28  ;;  %vm479_vm2 = vweird.f32 %v1402_v31 }
 0x124   : > { %1403 = vrsqrt.f32 %v547_v32  ;;  %vm480_vm4 = vmor %vm478_vm3, %vm479_vm2  ;;  %vm554_vm5 = vweird.f32 %v547_v32 }
 0x125   : > { %v474_v34 = vmul.f32 %v1402_v31, %v473_v33 }
 0x127   : > { %v475_v35 = vmul.f32 0.5, %v474_v34 }
 0x129   : > { %v476_v36 = vsub.f32 1.5, %v475_v35 }
 0x12a   : > { %v1404_v37 = vpop.eup %1403 }
 0x12b   : > { %v549_v38 = vmul.f32 %v1404_v37, %v547_v32  ;;  %v477_v39 = vmul.f32 %v1402_v31, %v476_v36  ;;  %vm555_vm6 = vweird.f32 %v1404_v37 }
 0x12c   : > { %vm556_vm7 = vmor %vm554_vm5, %vm555_vm6 }
 0x12d   : > { %v550_v40 = vmul.f32 %v1404_v37, %v549_v38  ;;  %v481_v41 = vsel %vm480_vm4, %v1402_v31, %v477_v39 }
 0x12e   : > { %v482_v42 = vmul.f32 %v481_v41, %v465_v14 }
 0x12f   : > { %v551_v43 = vmul.f32 0.5, %v550_v40 }
 0x130   : > { %v483_v44 = vpack.c.bf16 %v482_v42, %v482_v42 }
 0x131   : > { %v552_v45 = vsub.f32 1.5, %v551_v43 }
 0x132   : > { %1236 = vmatmul.msk.bf16.vlgmr.msra.gmra.mxu0 %vm453_vm0, %v483_v44 }
 0x133   : > { %v553_v46 = vmul.f32 %v1404_v37, %v552_v45 }
 0x135   : > { %v557_v47 = vsel %vm556_vm7, %v1404_v37, %v553_v46 }
 0x136   : > { %v558_v48 = vmul.f32 %v557_v47, %v541_v19 }
 0x138   : > { %v559_v49 = vpack.c.bf16 %v558_v48, %v558_v48 }
 0x13a   : > { %1245 = vmatmul.msk.bf16.vlgmr.msra.gmra.mxu1 %vm453_vm0, %v559_v49 }
 0x1af   : > { %v516_v51 = vpop.f32.mrf.mxu0 }
 0x1b0   : > { %v517_v52 = vadd.f32 %v1395_v50, %v516_v51 }
 0x1b2   : > { %v520_v53 = vpack.c.bf16 %v517_v52, %v517_v52 }
 0x1b4   : > { %522 = vst.msk [vmem:[#allocation2] sm:$0xf] %vm521_vm8, %v520_v53 }
 0x1b7   : > { %v518_v55 = vpop.f32.mrf.mxu0  ;;  %v592_v56 = vpop.f32.mrf.mxu1 }
 0x1b8   : > { %v593_v57 = vadd.f32 %v1396_v54, %v592_v56 }
 0x1ba   : > { %v596_v2 = vpack.c.bf16 %v593_v57, %v593_v57 }
 0x1bb   : > { %v597_v58 = vld [vmem:[#allocation2] sm:$0xf] }
 0x1bc   : > { %v736_v59 = vld [vmem:[#allocation2] sm:$0xf]  ;;  %v604_v61 = vsel %vm599_vm9, %v597_v58, 0  ;;  %v661_v8 = vunpack.c.l.b16 %v596_v2 }
 0x1bd   : > { %v658_v60 = vld [vmem:[#allocation2] sm:$0xf]  ;;  %v741_v62 = vunpack.c.l.b16 %v736_v59  ;;  %613 = vmatpush.bf16.xpose.msra.mxu2 %v604_v61 }
 0x1be   : > { %v666_v63 = vunpack.c.l.b16 %v658_v60  ;;  %v811_v0 = vld [vmem:[#allocation2] sm:$0xf]  ;;  %v662_v9 = vpack.c.b16 %v661_v8, %v661_v8 }
 0x1bf   : > { %v816_v1 = vunpack.c.l.b16 %v811_v0  ;;  %v742_v4 = vpack.c.b16 %v741_v62, %v741_v62  ;;  %v594_v6 = vpop.f32.mrf.mxu1 }
 0x1c0   : > { %v667_v5 = vpack.c.b16 %v666_v63, %v666_v63 }
 0x1c1   : > { %v817_v7 = vpack.c.b16 %v816_v1, %v816_v1  ;;  %743 = vrot.lane.b32.xlu0 %v742_v4, %s1540_s29 }
 0x1c2   : > { %668 = vrot.lane.b32.xlu2 %v667_v5, %s1541_s23 }
 0x1c3   : > { %818 = vrot.lane.b32.xlu1 %v817_v7, %s1542_s28 }
 0x1c4   : > { %1246 = vmatmul.msk.bf16.vlgmr.msra.gmra.mxu2 %vm599_vm9, %v596_v2 }
 0x1ca   : > { %663 = vrot.lane.b32.xlu2 %v662_v9, %s1541_s23 }
 0x1d2   : > { %738 = vrot.lane.b32.xlu2 %v662_v9, %s1540_s29 }
 0x1da   : > { %813 = vrot.lane.b32.xlu2 %v662_v9, %s1542_s28 }
 0x21c   : > { %v669_v10 = vpop.permute.xlu2 %668 }
 0x21d   : > { %v674_v12 = vsel %vm599_vm9, %v669_v10, 0 }
 0x21e   : > { %683 = vmatpush.bf16.xpose.msra.mxu3 %v674_v12 }
 0x224   : > { %v664_v13 = vpop.permute.xlu2 %663 }
 0x225   : > { %1248 = vmatmul.msk.bf16.vlgmr.msra.gmra.mxu3 %vm599_vm9, %v664_v13 }
 0x22c   : > { %v739_v14 = vpop.permute.xlu2 %738 }
 0x233   : > { %v744_v15 = vpop.permute.xlu0 %743 }
 0x234   : > { %v749_v17 = vsel %vm599_vm9, %v744_v15, 0  ;;  %v814_v19 = vpop.permute.xlu2 %813 }
 0x235   : > { %v819_v16 = vpop.permute.xlu1 %818  ;;  %758 = vmatpush.bf16.xpose.msrb.mxu1 %v749_v17 }
 0x236   : > { %v824_v18 = vsel %vm599_vm9, %v819_v16, 0 }
 0x237   : > { %833 = vmatpush.bf16.xpose.msrb.mxu3 %v824_v18 }
 0x23c   : > { %1250 = vmatmul.msk.bf16.vlgmr.msrb.gmra.mxu1 %vm599_vm9, %v739_v14 }
 0x23e   : > { %1252 = vmatmul.msk.bf16.vlgmr.msrb.gmra.mxu3 %vm599_vm9, %v814_v19 }
 0x247   : > { %v615_v20 = vpop.f32.mrf.mxu2 }
 0x248   : > { %v619_v21 = vsel %vm599_vm9, %v615_v20, -inf }
 0x249   : > { %620 = vmax.xlane.f32.xlu2 %v619_v21 }
 0x24f   : > { %v617_v22 = vpop.f32.mrf.mxu2 }
 0x2a8   : > { %v685_v23 = vpop.f32.mrf.mxu3 }
 0x2a9   : > { %v689_v24 = vsel %vm599_vm9, %v685_v23, -inf }
 0x2aa   : > { %690 = vmax.xlane.f32.xlu0 %v689_v24 }
 0x2b0   : > { %v687_v25 = vpop.f32.mrf.mxu3 }
 0x2b9   : > { %v760_v26 = vpop.f32.mrf.mxu1 }
 0x2ba   : > { %v764_v27 = vsel %vm599_vm9, %v760_v26, -inf }
 0x2bb   : > { %765 = vmax.xlane.f32.xlu1 %v764_v27 }
 0x2bc   : > { %v621_v34 = vpop.xlane.xlu2 %620 }
 0x2bd   : > { %v622_v60 = vsub.f32 %v615_v20, %v621_v34 }
 0x2be   : > { %524 = vrot.lane.b32.xlu0 %v520_v53, %s1543_s24  ;;  %s1884_s24 = sld [smem:[#allocation15_spill]] }
 0x2bf   : > { %v623_v0 = vpack.c.bf16 %v622_v60, %v622_v60 }
 0x2c1   : > { %v835_v28 = vpop.f32.mrf.mxu3  ;;  %v762_v30 = vpop.f32.mrf.mxu1  ;;  %v624_v5 = vunpack.c.l.bf16 %v623_v0 }
 0x2c2   : > { %v839_v29 = vsel %vm599_vm9, %v835_v28, -inf }
 0x2c3   : > { %840 = vmax.xlane.f32.xlu2 %v839_v29  ;;  %v625_v6 = vmul.f32 1.442695, %v624_v5 }
 0x2c9   : > { %v837_v31 = vpop.f32.mrf.mxu3 }
 0x31d   : > { %v691_v32 = vpop.xlane.xlu0 %690 }
 0x31e   : > { %v692_v33 = vsub.f32 %v685_v23, %v691_v32 }
 0x320   : > { %v693_v35 = vpack.c.bf16 %v692_v33, %v692_v33 }
 0x322   : > { %v694_v39 = vunpack.c.l.bf16 %v693_v35 }
 0x324   : > { %v695_v42 = vmul.f32 1.442695, %v694_v39 }
 0x32e   : > { %v766_v36 = vpop.xlane.xlu1 %765 }
 0x32f   : > { %v767_v37 = vsub.f32 %v760_v26, %v766_v36 }
 0x330   : > { %v525_v38 = vpop.permute.xlu0 %524 }
 0x331   : > { %527 = vst.msk [vmem:[#allocation3] sm:$0xf] %vm521_vm8, %v525_v38  ;;  %v768_v40 = vpack.c.bf16 %v767_v37, %v767_v37 }
 0x333   : > { %v769_v41 = vunpack.c.l.bf16 %v768_v40 }
 0x335   : > { %v770_v43 = vmul.f32 1.442695, %v769_v41 }
 0x336   : > { %v841_v44 = vpop.xlane.xlu2 %840 }
 0x337   : > { %v842_v45 = vsub.f32 %v835_v28, %v841_v44  ;;  %1405 = vpow2.f32 %v770_v43 }
 0x338   : > { %v598_v46 = vld [vmem:[#allocation3] sm:$0xf]  ;;  %1407 = vpow2.f32 %v695_v42 }
 0x339   : > { %v659_v47 = vld [vmem:[#allocation3] sm:$0xf]  ;;  %v843_v48 = vpack.c.bf16 %v842_v45, %v842_v45  ;;  %v640_v49 = vsel %vm638_vm10, %v598_v46, 0 }
 0x33a   : > { %v706_v50 = vunpack.c.l.b16 %v659_v47  ;;  %649 = vmatpush.bf16.msrb.mxu0 %v640_v49  ;;  %v737_v8 = vld [vmem:[#allocation3] sm:$0xf] }
 0x33b   : > { %v844_v51 = vunpack.c.l.bf16 %v843_v48  ;;  %v781_v10 = vunpack.c.l.b16 %v737_v8  ;;  %v812_v15 = vld [vmem:[#allocation3] sm:$0xf] }
 0x33c   : > { %v707_v52 = vpack.c.b16 %v706_v50, %v706_v50  ;;  %v856_v16 = vunpack.c.l.b16 %v812_v15 }
 0x33d   : > { %v845_v53 = vmul.f32 1.442695, %v844_v51  ;;  %v1406_v54 = vpop.eup %1405  ;;  %v782_v13 = vpack.c.b16 %v781_v10, %v781_v10 }
 0x33e   : > { %708 = vrot.lane.b32.xlu2 %v707_v52, %s1541_s23  ;;  %v772_v55 = vpack.c.bf16 %v1406_v54, %v1406_v54  ;;  %v1408_v56 = vpop.eup %1407  ;;  %v857_v17 = vpack.c.b16 %v856_v16, %v856_v16  ;;  %v1314_v52 = vld [vmem:[%s1863_s6 + $0x8] sm:$0xff] }
 0x33f   : > { %1409 = vpow2.f32 %v845_v53  ;;  %v697_v59 = vpack.c.bf16 %v1408_v56, %v1408_v56  ;;  %912 = vmatpush.bf16.msra.mxu1 %v1314_v52  ;;  %v1313_v53 = vld [vmem:[%s1863_s6] sm:$0xff] }
 0x340   : > { %v773_v57 = vunpack.c.l.bf16 %v772_v55  ;;  %1411 = vpow2.f32 %v625_v6 }
 0x341   : > { %v698_v63 = vunpack.c.l.bf16 %v697_v59 }
 0x342   : > { %v774_v58 = vsel %vm599_vm9, %v773_v57, 0.0 }
 0x343   : > { %775 = vadd.xlane.f32.xlu1 %v774_v58  ;;  %v699_v4 = vsel %vm599_vm9, %v698_v63, 0.0  ;;  %913 = vmatpush.bf16.msra.mxu1 %v1313_v53 }
 0x345   : > { %v1410_v61 = vpop.eup %1409 }
 0x346   : > { %v847_v62 = vpack.c.bf16 %v1410_v61, %v1410_v61  ;;  %v1412_v7 = vpop.eup %1411 }
 0x347   : > { %v627_v9 = vpack.c.bf16 %v1412_v7, %v1412_v7 }
 0x348   : > { %v848_v1 = vunpack.c.l.bf16 %v847_v62 }
 0x349   : > { %v628_v12 = vunpack.c.l.bf16 %v627_v9 }
 0x34a   : > { %v849_v2 = vsel %vm599_vm9, %v848_v1, 0.0 }
 0x34b   : > { %850 = vadd.xlane.f32.xlu0 %v849_v2  ;;  %700 = vadd.xlane.f32.xlu1 %v699_v4  ;;  %v629_v14 = vsel %vm599_vm9, %v628_v12, 0.0  ;;  %v1316_v4 = vld [vmem:[%s1864_s7 + $0x8] sm:$0xff] }
 0x364   : > { %783 = vrot.lane.b32.xlu1 %v782_v13, %s1540_s29 }
 0x367   : > { %630 = vadd.xlane.f32.xlu2 %v629_v14 }
 0x37f   : > { %858 = vrot.lane.b32.xlu2 %v857_v17, %s1542_s28 }
 0x398   : > { %v709_v18 = vpop.permute.xlu2 %708 }
 0x399   : > { %v714_v19 = vsel %vm638_vm10, %v709_v18, 0  ;;  %v1323_v18 = vld [vmem:[%s1866_s9 + $0x30] sm:$0xff] }
 0x39a   : > { %723 = vmatpush.bf16.msra.mxu0 %v714_v19  ;;  %v1397_v19 = vld [vmem:[%s1865_s8] ss:$0 sm:$0xff] }
 0x3b6   : > { %v776_v20 = vpop.xlane.xlu1 %775 }
 0x3b7   : > { %1413 = vrcp.f32 %v776_v20 }
 0x3bd   : > { %v1414_v22 = vpop.eup %1413 }
 0x3be   : > { %v701_v21 = vpop.xlane.xlu1 %700  ;;  %v778_v23 = vmul.f32 %v1414_v22, %v773_v57  ;;  %v851_v35 = vpop.xlane.xlu0 %850 }
 0x3c0   : > { %v779_v27 = vpack.c.bf16 %v778_v23, %v778_v23 }
 0x3d6   : > { %v784_v24 = vpop.permute.xlu1 %783 }
 0x3d7   : > { %v789_v25 = vsel %vm638_vm10, %v784_v24, 0  ;;  %v1321_v24 = vld [vmem:[%s1866_s9 + $0x20] sm:$0xff] }
 0x3d8   : > { %798 = vmatpush.bf16.msrb.mxu2 %v789_v25 }
 0x3da   : > { %v631_v26 = vpop.xlane.xlu2 %630 }
 0x3db   : > { %1415 = vrcp.f32 %v631_v26  ;;  %1251 = vmatmul.msk.bf16.vlgmr.msrb.gmra.mxu2 %vm599_vm9, %v779_v27 }
 0x3dc   : > { %1417 = vrcp.f32 %v701_v21  ;;  %972 = vmatpush.bf16.msra.mxu2 %v1316_v4  ;;  %v1322_v21 = vld [vmem:[%s1866_s9 + $0x28] sm:$0xff] }
 0x3dd   : > { %1419 = vrcp.f32 %v851_v35 }
 0x3e1   : > { %v1416_v28 = vpop.eup %1415 }
 0x3e2   : > { %v633_v29 = vmul.f32 %v1416_v28, %v628_v12  ;;  %v859_v30 = vpop.permute.xlu2 %858  ;;  %v1418_v33 = vpop.eup %1417  ;;  %v1320_v28 = vld [vmem:[%s1866_s9 + $0x18] sm:$0xff] }
 0x3e3   : > { %v864_v32 = vsel %vm638_vm10, %v859_v30, 0  ;;  %v703_v34 = vmul.f32 %v1418_v33, %v698_v63  ;;  %v1420_v37 = vpop.eup %1419  ;;  %v1319_v33 = vld [vmem:[%s1866_s9 + $0x10] sm:$0xff] }
 0x3e4   : > { %v634_v31 = vpack.c.bf16 %v633_v29, %v633_v29  ;;  %v853_v38 = vmul.f32 %v1420_v37, %v848_v1 }
 0x3e5   : > { %v704_v36 = vpack.c.bf16 %v703_v34, %v703_v34 }
 0x3e6   : > { %1247 = vmatmul.msk.bf16.vlgmr.msrb.gmra.mxu0 %vm599_vm9, %v634_v31  ;;  %v854_v39 = vpack.c.bf16 %v853_v38, %v853_v38  ;;  %v1318_v38 = vld [vmem:[%s1866_s9 + $0x8] sm:$0xff] }
 0x3e7   : > { %873 = vmatpush.bf16.msrb.mxu0 %v864_v32 }
 0x3f6   : > { %1249 = vmatmul.msk.bf16.vlgmr.msra.gmra.mxu0 %vm599_vm9, %v704_v36 }
 0x406   : > { %1253 = vmatmul.msk.bf16.vlgmr.msrb.gmra.mxu0 %vm599_vm9, %v854_v39 }
 0x45e   : > { %v800_v40 = vpop.f32.mrf.mxu2 }
 0x45f   : > { %v804_v41 = vpack.c.bf16 %v800_v40, %v800_v40 }
 0x461   : > { %806 = vrot.lane.b32.xlu1 %v804_v41, %s1544_s16 }
 0x463   : > { %v651_v42 = vpop.f32.mrf.mxu0 }
 0x464   : > { %v655_v43 = vpack.c.bf16 %v651_v42, %v651_v42  ;;  %v1317_v42 = vld [vmem:[%s1866_s9] sm:$0xff] }
 0x466   : > { %657 = vst.msk [vmem:[#allocation4] sm:$0xf] %vm656_vm11, %v655_v43  ;;  %v802_v44 = vpop.f32.mrf.mxu2 }
 0x46b   : > { %v653_v45 = vpop.f32.mrf.mxu0 }
 0x473   : > { %v725_v46 = vpop.f32.mrf.mxu0 }
 0x474   : > { %v729_v47 = vpack.c.bf16 %v725_v46, %v725_v46 }
 0x476   : > { %731 = vrot.lane.b32.xlu2 %v729_v47, %s1545_s15  ;;  %s1119_s15 = scalar_lea.hbm %s1884_s24, %s1306_s30 }
 0x477   : > { %s1123_s25 = sshll.u32 %s1119_s15, 4  ;;  %s1124_s25 = int_to_ptr.hbm [resolvable:$true] %s1123_s25 }
 0x478   : > { %s1469_s0 = sshra.s32 %s1124_s25, 4  ;;  %s1470_s0 = int_to_ptr.hbm [resolvable:$true] %s1469_s0 }
 0x479   : > { %s1471_s14 = scalar_lea.hbm %s1470_s0, 8  ;;  %p1476_p8 = scmp.lt.s32.totalorder %s1470_s0, %s1884_s24 }
 0x47a   : > { %p1472_p5 = scmp.ne.s32.totalorder %s1470_s0, %s1471_s14 }
 0x47b   : > { %v727_v48 = vpop.f32.mrf.mxu0 }
 0x47c   : > { %p1473_p6 = pnand %p1472_p5, %p1658_p9 }
 0x47e   : > { %p1474_p7 = pneg %p1473_p6 }
 0x483   : > { %v875_v49 = vpop.f32.mrf.mxu0 }
 0x484   : > { %v879_v50 = vpack.c.bf16 %v875_v49, %v875_v49 }
 0x486   : > { %881 = vrot.lane.b32.xlu2 %v879_v50, %s1546_s17  ;;  %s438_s17 = scalar_lea.vmem [#allocation8], %s1226_s27  ;;  %s1475_s27 = scalar_lea.hbm %s1884_s24, 16 }
 0x487   : > { %s1121_s11 = sshll.u32 %s438_s17, 4  ;;  %p1477_p10 = scmp.lt.s32.totalorder %s1475_s27, %s1471_s14  ;;  %s1122_s11 = int_to_ptr.vmem [resolvable:$true] %s1121_s11 }
 0x489   : > { %p1478_p13 = por %p1477_p10, %p1476_p8 }
 0x48b   : > { %v877_v51 = vpop.f32.mrf.mxu0  ;;  %p1479_p0 = pnand %p1478_p13, %p1474_p7 }
 0x4d0   : > { %v732_v54 = vpop.permute.xlu2 %731 }
 0x4d1   : > { %735 = vst.msk [vmem:[#allocation4] sm:$0xf] %vm734_vm12, %v732_v54 }
 0x4d3   : > { %v807_v55 = vpop.permute.xlu1 %806 }
 0x4d4   : > { %810 = vst.msk [vmem:[#allocation4] sm:$0xf] %vm809_vm13, %v807_v55 }
 0x4e0   : > { %v882_v56 = vpop.permute.xlu2 %881 }
 0x4e1   : > { %885 = vst.msk [vmem:[#allocation4] sm:$0xf] %vm884_vm14, %v882_v56 }
 0x4e8   : > { %v886_v57 = vld [vmem:[#allocation4] sm:$0xf] }
 0x4e9   : > { %1262 = vmatmul.msk.bf16.vlgmr.msra.gmra.mxu1 %vm453_vm0, %v886_v57 }
 0x566   : > { %v915_v58 = vpop.f32.mrf.mxu1 }
 0x567   : > { %v1771_v59 = vadd.f32 %v915_v58, %v1695_v3  ;;  %v1315_v3 = vld [vmem:[%s1864_s7] sm:$0xff] }
 0x568   : > { %973 = vmatpush.bf16.msra.mxu2 %v1315_v3 }
 0x569   : > { %v920_v60 = vsel %vm453_vm0, %v1771_v59, 0.0 }
 0x56a   : > { %921 = vadd.xlane.f32.xlu1 %v920_v60 }
 0x56e   : > { %v917_v61 = vpop.f32.mrf.mxu1 }
 0x5dd   : > { %v922_v62 = vpop.xlane.xlu1 %921 }
 0x5de   : > { %v923_v63 = vmul.f32 %v922_v62, %v1699_v11 }
 0x5e0   : > { %v924_v0 = vsub.f32 %v1771_v59, %v923_v63 }
 0x5e2   : > { %v925_v1 = vmul.f32 %v924_v0, %v924_v0 }
 0x5e4   : > { %v926_v2 = vsel %vm453_vm0, %v925_v1, 0.0 }
 0x5e5   : > { %927 = vadd.xlane.f32.xlu2 %v926_v2 }
 0x658   : > { %v928_v5 = vpop.xlane.xlu2 %927 }
 0x659   : > { %v929_v6 = vmul.f32 %v928_v5, %v1699_v11  ;;  %v1324_v11 = vld [vmem:[%s1866_s9 + $0x38] sm:$0xff] }
 0x65a   : > { %1092 = vmatpush.bf16.msra.mxu3 %v1324_v11 }
 0x65b   : > { %v930_v7 = vadd.f32 1e-05, %v929_v6  ;;  %v1398_v6 = vld [vmem:[%s1867_s10] ss:$0 sm:$0xff] }
 0x65d   : > { %1421 = vrsqrt.f32 %v930_v7  ;;  %vm937_vm1 = vweird.f32 %v930_v7 }
 0x65e   : > { %1093 = vmatpush.bf16.msra.mxu3 %v1323_v18 }
 0x662   : > { %1094 = vmatpush.bf16.msra.mxu3 %v1322_v21 }
 0x663   : > { %v1422_v8 = vpop.eup %1421 }
 0x664   : > { %v932_v9 = vmul.f32 %v1422_v8, %v930_v7  ;;  %vm938_vm15 = vweird.f32 %v1422_v8 }
 0x665   : > { %vm939_vm2 = vmor %vm937_vm1, %vm938_vm15 }
 0x666   : > { %v933_v10 = vmul.f32 %v1422_v8, %v932_v9  ;;  %1095 = vmatpush.bf16.msra.mxu3 %v1321_v24 }
 0x668   : > { %v934_v12 = vmul.f32 0.5, %v933_v10 }
 0x66a   : > { %v935_v13 = vsub.f32 1.5, %v934_v12  ;;  %1096 = vmatpush.bf16.msra.mxu3 %v1320_v28 }
 0x66c   : > { %v936_v14 = vmul.f32 %v1422_v8, %v935_v13 }
 0x66e   : > { %v940_v15 = vsel %vm939_vm2, %v1422_v8, %v936_v14  ;;  %1097 = vmatpush.bf16.msra.mxu3 %v1319_v33 }
 0x66f   : > { %v941_v16 = vmul.f32 %v940_v15, %v924_v0 }
 0x671   : > { %v942_v17 = vpack.c.bf16 %v941_v16, %v941_v16 }
 0x672   : > { %1098 = vmatpush.bf16.msra.mxu3 %v1318_v38 }
 0x673   : > { %1271 = vmatmul.msk.bf16.vlgmr.msra.gmra.mxu2 %vm453_vm0, %v942_v17 }
 0x676   : > { %1099 = vmatpush.bf16.msra.mxu3 %v1317_v42 }
 0x6f6   : > { %v975_v20 = vpop.f32.mrf.mxu2 }
 0x6f7   : > { %v976_v22 = vadd.f32 %v1397_v19, %v975_v20 }
 0x6f9   : > { %v980_v23 = vmul.f32 0.70710677, %v976_v22  ;;  %v979_v2 = vmul.f32 0.5, %v976_v22 }
 0x6fb   : > { %v981_v25 = vmul.f32 %v980_v23, %v980_v23 }
 0x6fd   : > { %v982_v26 = vmin.f32 %v981_v25, 16.0 }
 0x6fe   : > { %v977_v27 = vpop.f32.mrf.mxu2 }
 0x6ff   : > { %v983_v29 = vmul.f32 2.1237322e-06, %v982_v26  ;;  %v994_v30 = vmul.f32 3.8918573e-05, %v982_v26 }
 0x701   : > { %v984_v31 = vadd.f32 0.00028619796, %v983_v29  ;;  %v995_v32 = vadd.f32 0.001143296, %v994_v30 }
 0x703   : > { %v985_v34 = vmul.f32 %v984_v31, %v982_v26  ;;  %v996_v35 = vmul.f32 %v995_v32, %v982_v26 }
 0x705   : > { %v997_v36 = vadd.f32 0.014752088, %v996_v35  ;;  %v986_v37 = vadd.f32 0.0036580483, %v985_v34 }
 0x707   : > { %v998_v39 = vmul.f32 %v997_v36, %v982_v26  ;;  %v987_v41 = vmul.f32 %v986_v37, %v982_v26 }
 0x709   : > { %v999_v40 = vadd.f32 0.112945676, %v998_v39  ;;  %v988_v45 = vadd.f32 0.05243302, %v987_v41 }
 0x70b   : > { %v1000_v43 = vmul.f32 %v999_v40, %v982_v26  ;;  %v989_v48 = vmul.f32 %v988_v45, %v982_v26 }
 0x70d   : > { %v1001_v44 = vadd.f32 0.4994258, %v1000_v43  ;;  %v990_v49 = vadd.f32 0.18741608, %v989_v48 }
 0x70f   : > { %v1002_v46 = vmul.f32 %v1001_v44, %v982_v26  ;;  %v991_v51 = vmul.f32 %v990_v49, %v982_v26 }
 0x711   : > { %v1003_v47 = vadd.f32 1.0, %v1002_v46  ;;  %v992_v55 = vadd.f32 1.1283791, %v991_v51 }
 0x713   : > { %1423 = vrcp.f32 %v1003_v47  ;;  %v1015_v54 = vand.u32 2147483648, %v1003_v47  ;;  %v1013_v57 = vand.u32 2147483647, %v1003_v47  ;;  %vm1009_vm4 = vweird.f32 %v1003_v47 }
 0x714   : > { %v993_v61 = vmul.f32 %v992_v55, %v980_v23 }
 0x715   : > { %v1016_v60 = vor.u32 1.1754944e-38, %v1015_v54  ;;  %vm1014_vm6 = vcmp.eq.f32.partialorder %v1013_v57, 8.507059e+37 }
 0x719   : > { %v1424_v50 = vpop.eup %1423 }
 0x71a   : > { %v1005_v52 = vmul.f32 %v1424_v50, %v1003_v47  ;;  %vm1010_vm3 = vweird.f32 %v1424_v50 }
 0x71b   : > { %vm1011_vm5 = vmor %vm1009_vm4, %vm1010_vm3 }
 0x71c   : > { %v1006_v53 = vsub.f32 1.0, %v1005_v52 }
 0x71e   : > { %v1007_v56 = vmul.f32 %v1424_v50, %v1006_v53 }
 0x720   : > { %v1008_v58 = vadd.f32 %v1424_v50, %v1007_v56 }
 0x722   : > { %v1012_v62 = vsel %vm1011_vm5, %v1424_v50, %v1008_v58 }
 0x723   : > { %v1017_v63 = vsel %vm1014_vm6, %v1016_v60, %v1012_v62 }
 0x724   : > { %v1018_v0 = vmul.f32 %v1017_v63, %v993_v61 }
 0x726   : > { %v1272_v1 = vclamps-f32 %v1018_v0, 1.0 }
 0x728   : > { %v1021_v4 = vadd.f32 1.0, %v1272_v1 }
 0x72a   : > { %v1022_v3 = vmul.f32 %v1021_v4, %v979_v2 }
 0x72c   : > { %v1023_v5 = vpack.c.bf16 %v1022_v3, %v1022_v3 }
 0x72e   : > { %1100 = vmatmul.bf16.vlgmr.msra.gmra.mxu3 %v1023_v5 }
 0x7b1   : > { %v1101_v7 = vpop.f32.mrf.mxu3 }
 0x7b2   : > { %v1102_v8 = vadd.f32 %v1398_v6, %v1101_v7 }
 0x7b4   : > { %v1105_v9 = vadd.f32 %v1102_v8, %v1771_v59 }
 0x7b6   : > { %1106 = vst.msk [vmem:[%s438_s17] sm:$0xff] %vm453_vm0, %v1105_v9 }
 0x7b7   : > { %1482 = shalt.err (!%p1479_p0)
}
 0x7b8   : > { %1327 = dma.vmem_to_hbm [thread:$0]  (%p1658_p9), %s1122_s11, 128, %s1124_s25, %s1108_s20  }
 0x7b9   : > { %v1103_v59 = vpop.f32.mrf.mxu3 }
 0x7ba PF: > { %s1886_s26 = sld [smem:[#allocation11_spill]]  ;;  %p1334_p1 = pnand %p1221_p12, %p1665_p11 }
 0x7bc   : > { %p1335_p2 = pneg %p1334_p1 }
 0x7c0   : > { %s1135_s15 = sand.u32 1, %s1886_s26  }
 0x7c1   : > { %s1136_s17 = scalar_lea.sflag [#allocation7], %s1135_s15 }
 0x7c2   : > { %1512 = dma.done.wait (%p1335_p2), %s1136_s17, 128  }
 0x7c3   : > { %1514 = vsyncadd (%p1335_p2), %s1136_s17, 4294967168  ;;  %s27_s22 = sadd.s32 1, %s1537_s22   ;;  %s1887_s0 = sld [smem:[#allocation12_spill]] }
 0x7c4   : > { %p24_p3 = scmp.ge.s32.totalorder %s27_s22, 4   ;;  %s1888_s17 = smov %s1521_s18 }
 0x7c5   : > { %s1889_s18 = smov %s1525_s19  ;;  %s1890_s19 = smov %s1663_s12 }
 0x7c6   : > { %s1891_s20 = smov %s1533_s21  ;;  %26 = sbr.rel (!%p24_p3) target bundleno = 9 (0x9), region = 116 }
 0x7c9   : > { %s1892_s21 = smov %s1887_s0 }
 0x7cb   :  { %1142 = vsyncpa [#allocation6], 1 }
 0x7cc   :  { %1144 = vsyncpa [#allocation6 + $0x1], 1 }
 0x7cd   :  { %1145 = vsyncpa [#allocation7], 1 }
 0x7ce   :  { %1147 = vsyncpa [#allocation7 + $0x1], 1 }

// kernel: tpu_custom_call.1
= control target key start
LH: loop header
LB: loop body
LE: loop exit
PB: predicated region body
PF: predicated region fallthrough
CT: control target
= control target key end

     0   :  { %s1857_s0 = inlined_call_operand.vmem [shape: f32[2,8,32], index: 0, kind: input, shape index: {}]   ;;  %s1858_s1 = inlined_call_operand.hbm [shape: bf16[2,8,32], index: 1, kind: input, shape index: {}]   ;;  %s1859_s2 = inlined_call_operand.vmem [shape: bf16[32,32], index: 2, kind: input, shape index: {}]   ;;  %s1860_s3 = inlined_call_operand.vmem [shape: f32[1,32], index: 3, kind: input, shape index: {}]   ;;  %s1861_s4 = inlined_call_operand.vmem [shape: bf16[32,64], index: 4, kind: input, shape index: {}]   ;;  %s1862_s5 = inlined_call_operand.vmem [shape: f32[1,64], index: 5, kind: input, shape index: {}]   ;;  %s1863_s6 = inlined_call_operand.vmem [shape: bf16[32,32], index: 6, kind: input, shape index: {}]   ;;  %s1864_s7 = inlined_call_operand.vmem [shape: bf16[32,128], index: 7, kind: input, shape index: {}]   ;;  %s1865_s8 = inlined_call_operand.vmem [shape: f32[1,128], index: 8, kind: input, shape index: {}]   ;;  %s1866_s9 = inlined_call_operand.vmem [shape: bf16[128,32], index: 9, kind: input, shape index: {}]   ;;  %s1867_s10 = inlined_call_operand.vmem [shape: f32[1,32], index: 10, kind: input, shape index: {}]   ;;  %s1868_s11 = inlined_call_operand.hbm [shape: f32[2,8,32], index: 11, kind: output, shape index: {}]  }
   0x1   :  { %1874 = sst [smem:[#allocation14_spill]] %s1857_s0 }
   0x2   :  { %1875 = sst [smem:[#allocation15_spill]] %s1868_s11 }
   0x3   :  { %16 = vsyncpa [#allocation6], 0 }
   0x4   :  { %18 = vsyncpa [#allocation6 + $0x1], 0 }
   0x5   :  { %19 = vsyncpa [#allocation7], 0 }
   0x6   :  { %21 = vsyncpa [#allocation7 + $0x1], 0  ;;  %s1607_s17 = smov 0   ;;  %s1609_s18 = smov 0  }
   0x7   :  { %s1611_s19 = smov 0   ;;  %s1613_s20 = smov 0  }
   0x8   :  { %s1615_s21 = smov 0   ;;  %s1617_s22 = smov 0  }
   0x9 LB: > { %1876 = sst [smem:[#allocation11_spill]] %s1517_s17  ;;  %s1218_s23 = sadd.s32 4294967295, %s1537_s22   ;;  %s1537_s22 = sphi %s1617_s22, %s27_s22   ;;  %s1533_s21 = sphi %s1615_s21, %s1892_s21   ;;  %s1529_s20 = sphi %s1613_s20, %s1891_s20   ;;  %s1525_s19 = sphi %s1611_s19, %s1890_s19   ;;  %s1521_s18 = sphi %s1609_s18, %s1889_s18   ;;  %s1517_s17 = sphi %s1607_s17, %s1888_s17  }
   0xa   : > { %s1219_s24 = sadd.s32 4294967294, %s1537_s22   ;;  %s39_s25 = sadd.s32 1, %s1533_s21 }
   0xb   : > { %s74_s26 = sadd.s32 1, %s1525_s19  ;;  %p41_p0 = scmp.ge.s32.totalorder %s39_s25, 2 }
   0xc   : > { %p81_p1 = scmp.ne.s32.totalorder %s1525_s19, %s1521_s18  ;;  %p82_p2 = scmp.eq.s32.totalorder %s1537_s22, 0 }
   0xd   : > { %p87_p3 = scmp.ne.s32.totalorder %s1521_s18, %s1517_s17  ;;  %s1894_s25 = smov (%p41_p0, %s39_s25), 0 }
   0xe   : > { %1877 = sst [smem:[#allocation12_spill]] %s1894_s25  ;;  %p1648_p4 = por %p82_p2, %p81_p1 }
   0xf   : > { %p88_p5 = scmp.eq.s32.totalorder %s1218_s23, 0  ;;  %s71_s28 = ssub.s32 %s1533_s21, %s1894_s25 }
  0x10   : > { %p302_p6 = scmp.eq.s32.totalorder %s1218_s23, 1  ;;  %p72_p7 = scmp.eq.s32.totalorder %s71_s28, 0 }
  0x11   : > { %p1654_p8 = por %p88_p5, %p87_p3  ;;  %p308_p10 = scmp.eq.s32.totalorder %s1219_s24, 1 }
  0x12   : > { %p1658_p9 = por %p302_p6, %p81_p1  ;;  %p1221_p12 = scmp.ge.s32.totalorder %s1537_s22, 2 }
  0x13   : > { %s1663_s12 = scalar_select %p72_p7, %s1525_s19, %s74_s26  }
  0x14   : > { %s1880_s30 = scalar_select %p1658_p9, 1, 0 }
  0x15   : > { %p1665_p11 = por %p308_p10, %p87_p3  ;;  %p1337_p13 = scmp.lt.s32.totalorder %s1537_s22, 2 }
  0x16   : > { %1881 = sst [smem:[#allocation13_spill]] %s1880_s30  ;;  %s365_s14 = sand.u32 1, %s1525_s19  }
  0x17   : > { %s1222_s15 = sshll.u32 %s365_s14, 2  ;;  %s1223_s16 = sshll.u32 %s1533_s21, 2 }
  0x18   : > { %s373_s25 = scalar_lea.hbm %s1858_s1, %s1223_s16  ;;  %s369_s17 = scalar_lea.vmem [#allocation5], %s1222_s15 }
  0x19   : > { %s377_s30 = sshll.u32 %s369_s17, 4  ;;  %s375_s11 = sshll.u32 %s373_s25, 4  ;;  %s378_s30 = int_to_ptr.vmem [resolvable:$true] %s377_s30  ;;  %s376_s11 = int_to_ptr.hbm [resolvable:$true] %s375_s11 }
  0x1a   : > { %p1330_p0 = pnand %p1337_p13, %p1648_p4  ;;  %p1224_p1 = scmp.ge.s32.totalorder %s1537_s22, 1 }
  0x1b   : > { %p382_p2 = scmp.lt.s32.totalorder %s1537_s22, 3  ;;  %s366_s24 = scalar_lea.sflag [#allocation6], %s365_s14 }
  0x1c   : > { %1332 = dma.hbm_to_vmem [thread:$0]  (!%p1330_p0), %s376_s11, 64, %s378_s30, %s366_s24  }
  0x1d   : > { %p383_p3 = pnand %p1224_p1, %p382_p2 }
  0x1e   : > { %s1681_s26 = sand.u32 (!%p383_p3), 1, %s1521_s18  }
  0x1f   : > { %386 = sbr.rel (%p383_p3) target bundleno = 1978 (0x7ba), region = 64  ;;  %s1225_s16 = sshll.u32 (!%p383_p3), %s1681_s26, 2 }
  0x20   : > { %s389_s15 = scalar_lea.sflag (!%p383_p3), [#allocation6], %s1681_s26  ;;  %s392_s17 = scalar_lea.vmem (!%p383_p3), [#allocation5], %s1225_s16 }
  0x24   : > { %1508 = dma.done.wait (%p1654_p8), %s389_s15, 64  }
  0x25   : > { %1510 = vsyncadd (%p1654_p8), %s389_s15, 4294967232  ;;  %p439_p4 = scmp.lt.s32.totalorder %s1529_s20, 1  ;;  %v451_v0 = vld [vmem:[%s392_s17] sm:$0xf]  ;;  %vm453_vm0 = vcmask 261120   ;;  %s1883_s0 = sld [smem:[#allocation14_spill]] }
  0x26   : > { %v452_v1 = vunpack.c.l.bf16 %v451_v0  ;;  %v1539_v5 = vmov 32.0   ;;  %v1310_v22 = vld [vmem:[%s1861_s4 + $0x8] sm:$0xff]  ;;  %v1309_v23 = vld [vmem:[%s1861_s4] sm:$0xff]  ;;  %vm521_vm8 = vcmask 257024   ;;  %vm599_vm9 = vcmask 64512   ;;  %s1540_s29 = smov 112  }
  0x27   : > { %s440_s11 = scalar_select %p439_p4, %s1529_s20, 1  ;;  %1399 = vrcp.f32 %v1539_v5  ;;  %513 = vmatpush.bf16.msra.mxu0 %v1310_v22  ;;  %v1312_v24 = vld [vmem:[%s1859_s2 + $0x8] sm:$0xff]  ;;  %v1311_v25 = vld [vmem:[%s1859_s2] sm:$0xff]  ;;  %vm638_vm10 = vcmask 1043456   ;;  %vm656_vm11 = vcmask 60416   ;;  %vm734_vm12 = vcmask 126016  }
  0x28   : > { %v454_v2 = vsel %vm453_vm0, %v452_v1, 0.0  ;;  %589 = vmatpush.bf16.msra.mxu1 %v1312_v24  ;;  %v1395_v50 = vld [vmem:[%s1862_s5] ss:$0 sm:$0xff]  ;;  %s1541_s23 = smov 120   ;;  %s1542_s28 = smov 104   ;;  %vm809_vm13 = vcmask 191616  }
  0x29   : > { %s1227_s25 = sshll.u32 %s440_s11, 3  ;;  %455 = vadd.xlane.f32.xlu0 %v454_v2  ;;  %v1396_v54 = vld [vmem:[%s1860_s3] ss:$0 sm:$0xff]  ;;  %s1543_s24 = smov 96   ;;  %vm884_vm14 = vcmask 257216  }
  0x2a   : > { %s1544_s16 = smov 16   ;;  %s1545_s15 = smov 8  }
  0x2b   : > { %s445_s14 = scalar_lea.vmem %s1883_s0, %s1227_s25  ;;  %514 = vmatpush.bf16.msra.mxu0 %v1309_v23  ;;  %s1546_s17 = smov 24  }
  0x2c   : > { %v1695_v3 = vld [vmem:[%s445_s14] sm:$0xff]  ;;  %590 = vmatpush.bf16.msra.mxu1 %v1311_v25  ;;  %s1226_s27 = sshll.u32 %s1681_s26, 3  ;;  %s1306_s30 = sshll.u32 %s1529_s20, 3 }
  0x2d   : > { %v530_v4 = vsel %vm453_vm0, %v1695_v3, 0.0  ;;  %v1400_v6 = vpop.eup %1399  ;;  %s1108_s20 = scalar_lea.sflag [#allocation7], %s1681_s26 }
  0x2e   : > { %v458_v7 = vmul.f32 32.0, %v1400_v6  ;;  %vm462_vm1 = vweird.f32 %v1400_v6 }
  0x30   : > { %v459_v8 = vsub.f32 1.0, %v458_v7 }
  0x31   : > { %531 = vadd.xlane.f32.xlu0 %v530_v4 }
  0x32   : > { %v460_v9 = vmul.f32 %v1400_v6, %v459_v8 }
  0x34   : > { %v461_v10 = vadd.f32 %v1400_v6, %v460_v9 }
  0x36   : > { %v1699_v11 = vsel %vm462_vm1, %v1400_v6, %v461_v10 }
  0x9c   : > { %v456_v12 = vpop.xlane.xlu0 %455 }
  0x9d   : > { %v464_v13 = vmul.f32 %v1699_v11, %v456_v12 }
  0x9f   : > { %v465_v14 = vsub.f32 %v452_v1, %v464_v13 }
  0xa1   : > { %v466_v15 = vmul.f32 %v465_v14, %v465_v14 }
  0xa3   : > { %v467_v16 = vsel %vm453_vm0, %v466_v15, 0.0 }
  0xa4   : > { %468 = vadd.xlane.f32.xlu1 %v467_v16  ;;  %v532_v17 = vpop.xlane.xlu0 %531 }
  0xa5   : > { %v540_v18 = vmul.f32 %v532_v17, %v1699_v11 }
  0xa7   : > { %v541_v19 = vsub.f32 %v1695_v3, %v540_v18 }
  0xa9   : > { %v542_v20 = vmul.f32 %v541_v19, %v541_v19 }
  0xab   : > { %v543_v21 = vsel %vm453_vm0, %v542_v20, 0.0 }
  0xac   : > { %544 = vadd.xlane.f32.xlu1 %v543_v21 }
 0x117   : > { %v469_v26 = vpop.xlane.xlu1 %468 }
 0x118   : > { %v470_v27 = vmul.f32 %v469_v26, %v1699_v11 }
 0x11a   : > { %v471_v28 = vadd.f32 1e-05, %v470_v27 }
 0x11c   : > { %1401 = vrsqrt.f32 %v471_v28  ;;  %vm478_vm3 = vweird.f32 %v471_v28 }
 0x11f   : > { %v545_v29 = vpop.xlane.xlu1 %544 }
 0x120   : > { %v546_v30 = vmul.f32 %v545_v29, %v1699_v11 }
 0x122   : > { %v1402_v31 = vpop.eup %1401  ;;  %v547_v32 = vadd.f32 1e-05, %v546_v30 }
 0x123   : > { %v473_v33 = vmul.f32 %v1402_v31, %v471_v28  ;;  %vm479_vm2 = vweird.f32 %v1402_v31 }
 0x124   : > { %1403 = vrsqrt.f32 %v547_v32  ;;  %vm480_vm4 = vmor %vm478_vm3, %vm479_vm2  ;;  %vm554_vm5 = vweird.f32 %v547_v32 }
 0x125   : > { %v474_v34 = vmul.f32 %v1402_v31, %v473_v33 }
 0x127   : > { %v475_v35 = vmul.f32 0.5, %v474_v34 }
 0x129   : > { %v476_v36 = vsub.f32 1.5, %v475_v35 }
 0x12a   : > { %v1404_v37 = vpop.eup %1403 }
 0x12b   : > { %v549_v38 = vmul.f32 %v1404_v37, %v547_v32  ;;  %v477_v39 = vmul.f32 %v1402_v31, %v476_v36  ;;  %vm555_vm6 = vweird.f32 %v1404_v37 }
 0x12c   : > { %vm556_vm7 = vmor %vm554_vm5, %vm555_vm6 }
 0x12d   : > { %v550_v40 = vmul.f32 %v1404_v37, %v549_v38  ;;  %v481_v41 = vsel %vm480_vm4, %v1402_v31, %v477_v39 }
 0x12e   : > { %v482_v42 = vmul.f32 %v481_v41, %v465_v14 }
 0x12f   : > { %v551_v43 = vmul.f32 0.5, %v550_v40 }
 0x130   : > { %v483_v44 = vpack.c.bf16 %v482_v42, %v482_v42 }
 0x131   : > { %v552_v45 = vsub.f32 1.5, %v551_v43 }
 0x132   : > { %1236 = vmatmul.msk.bf16.vlgmr.msra.gmra.mxu0 %vm453_vm0, %v483_v44 }
 0x133   : > { %v553_v46 = vmul.f32 %v1404_v37, %v552_v45 }
 0x135   : > { %v557_v47 = vsel %vm556_vm7, %v1404_v37, %v553_v46 }
 0x136   : > { %v558_v48 = vmul.f32 %v557_v47, %v541_v19 }
 0x138   : > { %v559_v49 = vpack.c.bf16 %v558_v48, %v558_v48 }
 0x13a   : > { %1245 = vmatmul.msk.bf16.vlgmr.msra.gmra.mxu1 %vm453_vm0, %v559_v49 }
 0x1af   : > { %v516_v51 = vpop.f32.mrf.mxu0 }
 0x1b0   : > { %v517_v52 = vadd.f32 %v1395_v50, %v516_v51 }
 0x1b2   : > { %v520_v53 = vpack.c.bf16 %v517_v52, %v517_v52 }
 0x1b4   : > { %522 = vst.msk [vmem:[#allocation2] sm:$0xf] %vm521_vm8, %v520_v53 }
 0x1b7   : > { %v518_v55 = vpop.f32.mrf.mxu0  ;;  %v592_v56 = vpop.f32.mrf.mxu1 }
 0x1b8   : > { %v593_v57 = vadd.f32 %v1396_v54, %v592_v56 }
 0x1ba   : > { %v596_v2 = vpack.c.bf16 %v593_v57, %v593_v57 }
 0x1bb   : > { %v597_v58 = vld [vmem:[#allocation2] sm:$0xf] }
 0x1bc   : > { %v736_v59 = vld [vmem:[#allocation2] sm:$0xf]  ;;  %v604_v61 = vsel %vm599_vm9, %v597_v58, 0  ;;  %v661_v8 = vunpack.c.l.b16 %v596_v2 }
 0x1bd   : > { %v658_v60 = vld [vmem:[#allocation2] sm:$0xf]  ;;  %v741_v62 = vunpack.c.l.b16 %v736_v59  ;;  %613 = vmatpush.bf16.xpose.msra.mxu2 %v604_v61 }
 0x1be   : > { %v666_v63 = vunpack.c.l.b16 %v658_v60  ;;  %v811_v0 = vld [vmem:[#allocation2] sm:$0xf]  ;;  %v662_v9 = vpack.c.b16 %v661_v8, %v661_v8 }
 0x1bf   : > { %v816_v1 = vunpack.c.l.b16 %v811_v0  ;;  %v742_v4 = vpack.c.b16 %v741_v62, %v741_v62  ;;  %v594_v6 = vpop.f32.mrf.mxu1 }
 0x1c0   : > { %v667_v5 = vpack.c.b16 %v666_v63, %v666_v63 }
 0x1c1   : > { %v817_v7 = vpack.c.b16 %v816_v1, %v816_v1  ;;  %743 = vrot.lane.b32.xlu0 %v742_v4, %s1540_s29 }
 0x1c2   : > { %668 = vrot.lane.b32.xlu2 %v667_v5, %s1541_s23 }
 0x1c3   : > { %818 = vrot.lane.b32.xlu1 %v817_v7, %s1542_s28 }
 0x1c4   : > { %1246 = vmatmul.msk.bf16.vlgmr.msra.gmra.mxu2 %vm599_vm9, %v596_v2 }
 0x1ca   : > { %663 = vrot.lane.b32.xlu2 %v662_v9, %s1541_s23 }
 0x1d2   : > { %738 = vrot.lane.b32.xlu2 %v662_v9, %s1540_s29 }
 0x1da   : > { %813 = vrot.lane.b32.xlu2 %v662_v9, %s1542_s28 }
 0x21c   : > { %v669_v10 = vpop.permute.xlu2 %668 }
 0x21d   : > { %v674_v12 = vsel %vm599_vm9, %v669_v10, 0 }
 0x21e   : > { %683 = vmatpush.bf16.xpose.msra.mxu3 %v674_v12 }
 0x224   : > { %v664_v13 = vpop.permute.xlu2 %663 }
 0x225   : > { %1248 = vmatmul.msk.bf16.vlgmr.msra.gmra.mxu3 %vm599_vm9, %v664_v13 }
 0x22c   : > { %v739_v14 = vpop.permute.xlu2 %738 }
 0x233   : > { %v744_v15 = vpop.permute.xlu0 %743 }
 0x234   : > { %v749_v17 = vsel %vm599_vm9, %v744_v15, 0  ;;  %v814_v19 = vpop.permute.xlu2 %813 }
 0x235   : > { %v819_v16 = vpop.permute.xlu1 %818  ;;  %758 = vmatpush.bf16.xpose.msrb.mxu1 %v749_v17 }
 0x236   : > { %v824_v18 = vsel %vm599_vm9, %v819_v16, 0 }
 0x237   : > { %833 = vmatpush.bf16.xpose.msrb.mxu3 %v824_v18 }
 0x23c   : > { %1250 = vmatmul.msk.bf16.vlgmr.msrb.gmra.mxu1 %vm599_vm9, %v739_v14 }
 0x23e   : > { %1252 = vmatmul.msk.bf16.vlgmr.msrb.gmra.mxu3 %vm599_vm9, %v814_v19 }
 0x247   : > { %v615_v20 = vpop.f32.mrf.mxu2 }
 0x248   : > { %v619_v21 = vsel %vm599_vm9, %v615_v20, -inf }
 0x249   : > { %620 = vmax.xlane.f32.xlu2 %v619_v21 }
 0x24f   : > { %v617_v22 = vpop.f32.mrf.mxu2 }
 0x2a8   : > { %v685_v23 = vpop.f32.mrf.mxu3 }
 0x2a9   : > { %v689_v24 = vsel %vm599_vm9, %v685_v23, -inf }
 0x2aa   : > { %690 = vmax.xlane.f32.xlu0 %v689_v24 }
 0x2b0   : > { %v687_v25 = vpop.f32.mrf.mxu3 }
 0x2b9   : > { %v760_v26 = vpop.f32.mrf.mxu1 }
 0x2ba   : > { %v764_v27 = vsel %vm599_vm9, %v760_v26, -inf }
 0x2bb   : > { %765 = vmax.xlane.f32.xlu1 %v764_v27 }
 0x2bc   : > { %v621_v34 = vpop.xlane.xlu2 %620 }
 0x2bd   : > { %v622_v60 = vsub.f32 %v615_v20, %v621_v34 }
 0x2be   : > { %524 = vrot.lane.b32.xlu0 %v520_v53, %s1543_s24  ;;  %s1884_s24 = sld [smem:[#allocation15_spill]] }
 0x2bf   : > { %v623_v0 = vpack.c.bf16 %v622_v60, %v622_v60 }
 0x2c1   : > { %v835_v28 = vpop.f32.mrf.mxu3  ;;  %v762_v30 = vpop.f32.mrf.mxu1  ;;  %v624_v5 = vunpack.c.l.bf16 %v623_v0 }
 0x2c2   : > { %v839_v29 = vsel %vm599_vm9, %v835_v28, -inf }
 0x2c3   : > { %840 = vmax.xlane.f32.xlu2 %v839_v29  ;;  %v625_v6 = vmul.f32 1.442695, %v624_v5 }
 0x2c9   : > { %v837_v31 = vpop.f32.mrf.mxu3 }
 0x31d   : > { %v691_v32 = vpop.xlane.xlu0 %690 }
 0x31e   : > { %v692_v33 = vsub.f32 %v685_v23, %v691_v32 }
 0x320   : > { %v693_v35 = vpack.c.bf16 %v692_v33, %v692_v33 }
 0x322   : > { %v694_v39 = vunpack.c.l.bf16 %v693_v35 }
 0x324   : > { %v695_v42 = vmul.f32 1.442695, %v694_v39 }
 0x32e   : > { %v766_v36 = vpop.xlane.xlu1 %765 }
 0x32f   : > { %v767_v37 = vsub.f32 %v760_v26, %v766_v36 }
 0x330   : > { %v525_v38 = vpop.permute.xlu0 %524 }
 0x331   : > { %527 = vst.msk [vmem:[#allocation3] sm:$0xf] %vm521_vm8, %v525_v38  ;;  %v768_v40 = vpack.c.bf16 %v767_v37, %v767_v37 }
 0x333   : > { %v769_v41 = vunpack.c.l.bf16 %v768_v40 }
 0x335   : > { %v770_v43 = vmul.f32 1.442695, %v769_v41 }
 0x336   : > { %v841_v44 = vpop.xlane.xlu2 %840 }
 0x337   : > { %v842_v45 = vsub.f32 %v835_v28, %v841_v44  ;;  %1405 = vpow2.f32 %v770_v43 }
 0x338   : > { %v598_v46 = vld [vmem:[#allocation3] sm:$0xf]  ;;  %1407 = vpow2.f32 %v695_v42 }
 0x339   : > { %v659_v47 = vld [vmem:[#allocation3] sm:$0xf]  ;;  %v843_v48 = vpack.c.bf16 %v842_v45, %v842_v45  ;;  %v640_v49 = vsel %vm638_vm10, %v598_v46, 0 }
 0x33a   : > { %v706_v50 = vunpack.c.l.b16 %v659_v47  ;;  %649 = vmatpush.bf16.msrb.mxu0 %v640_v49  ;;  %v737_v8 = vld [vmem:[#allocation3] sm:$0xf] }
 0x33b   : > { %v844_v51 = vunpack.c.l.bf16 %v843_v48  ;;  %v781_v10 = vunpack.c.l.b16 %v737_v8  ;;  %v812_v15 = vld [vmem:[#allocation3] sm:$0xf] }
 0x33c   : > { %v707_v52 = vpack.c.b16 %v706_v50, %v706_v50  ;;  %v856_v16 = vunpack.c.l.b16 %v812_v15 }
 0x33d   : > { %v845_v53 = vmul.f32 1.442695, %v844_v51  ;;  %v1406_v54 = vpop.eup %1405  ;;  %v782_v13 = vpack.c.b16 %v781_v10, %v781_v10 }
 0x33e   : > { %708 = vrot.lane.b32.xlu2 %v707_v52, %s1541_s23  ;;  %v772_v55 = vpack.c.bf16 %v1406_v54, %v1406_v54  ;;  %v1408_v56 = vpop.eup %1407  ;;  %v857_v17 = vpack.c.b16 %v856_v16, %v856_v16  ;;  %v1314_v52 = vld [vmem:[%s1863_s6 + $0x8] sm:$0xff] }
 0x33f   : > { %1409 = vpow2.f32 %v845_v53  ;;  %v697_v59 = vpack.c.bf16 %v1408_v56, %v1408_v56  ;;  %912 = vmatpush.bf16.msra.mxu1 %v1314_v52  ;;  %v1313_v53 = vld [vmem:[%s1863_s6] sm:$0xff] }
 0x340   : > { %v773_v57 = vunpack.c.l.bf16 %v772_v55  ;;  %1411 = vpow2.f32 %v625_v6 }
 0x341   : > { %v698_v63 = vunpack.c.l.bf16 %v697_v59 }
 0x342   : > { %v774_v58 = vsel %vm599_vm9, %v773_v57, 0.0 }
 0x343   : > { %775 = vadd.xlane.f32.xlu1 %v774_v58  ;;  %v699_v4 = vsel %vm599_vm9, %v698_v63, 0.0  ;;  %913 = vmatpush.bf16.msra.mxu1 %v1313_v53 }
 0x345   : > { %v1410_v61 = vpop.eup %1409 }
 0x346   : > { %v847_v62 = vpack.c.bf16 %v1410_v61, %v1410_v61  ;;  %v1412_v7 = vpop.eup %1411 }
 0x347   : > { %v627_v9 = vpack.c.bf16 %v1412_v7, %v1412_v7 }
 0x348   : > { %v848_v1 = vunpack.c.l.bf16 %v847_v62 }
 0x349   : > { %v628_v12 = vunpack.c.l.bf16 %v627_v9 }
 0x34a   : > { %v849_v2 = vsel %vm599_vm9, %v848_v1, 0.0 }
 0x34b   : > { %850 = vadd.xlane.f32.xlu0 %v849_v2  ;;  %700 = vadd.xlane.f32.xlu1 %v699_v4  ;;  %v629_v14 = vsel %vm599_vm9, %v628_v12, 0.0  ;;  %v1316_v4 = vld [vmem:[%s1864_s7 + $0x8] sm:$0xff] }
 0x364   : > { %783 = vrot.lane.b32.xlu1 %v782_v13, %s1540_s29 }
 0x367   : > { %630 = vadd.xlane.f32.xlu2 %v629_v14 }
 0x37f   : > { %858 = vrot.lane.b32.xlu2 %v857_v17, %s1542_s28 }
 0x398   : > { %v709_v18 = vpop.permute.xlu2 %708 }
 0x399   : > { %v714_v19 = vsel %vm638_vm10, %v709_v18, 0  ;;  %v1323_v18 = vld [vmem:[%s1866_s9 + $0x30] sm:$0xff] }
 0x39a   : > { %723 = vmatpush.bf16.msra.mxu0 %v714_v19  ;;  %v1397_v19 = vld [vmem:[%s1865_s8] ss:$0 sm:$0xff] }
 0x3b6   : > { %v776_v20 = vpop.xlane.xlu1 %775 }
 0x3b7   : > { %1413 = vrcp.f32 %v776_v20 }
 0x3bd   : > { %v1414_v22 = vpop.eup %1413 }
 0x3be   : > { %v701_v21 = vpop.xlane.xlu1 %700  ;;  %v778_v23 = vmul.f32 %v1414_v22, %v773_v57  ;;  %v851_v35 = vpop.xlane.xlu0 %850 }
 0x3c0   : > { %v779_v27 = vpack.c.bf16 %v778_v23, %v778_v23 }
 0x3d6   : > { %v784_v24 = vpop.permute.xlu1 %783 }
 0x3d7   : > { %v789_v25 = vsel %vm638_vm10, %v784_v24, 0  ;;  %v1321_v24 = vld [vmem:[%s1866_s9 + $0x20] sm:$0xff] }
 0x3d8   : > { %798 = vmatpush.bf16.msrb.mxu2 %v789_v25 }
 0x3da   : > { %v631_v26 = vpop.xlane.xlu2 %630 }
 0x3db   : > { %1415 = vrcp.f32 %v631_v26  ;;  %1251 = vmatmul.msk.bf16.vlgmr.msrb.gmra.mxu2 %vm599_vm9, %v779_v27 }
 0x3dc   : > { %1417 = vrcp.f32 %v701_v21  ;;  %972 = vmatpush.bf16.msra.mxu2 %v1316_v4  ;;  %v1322_v21 = vld [vmem:[%s1866_s9 + $0x28] sm:$0xff] }
 0x3dd   : > { %1419 = vrcp.f32 %v851_v35 }
 0x3e1   : > { %v1416_v28 = vpop.eup %1415 }
 0x3e2   : > { %v633_v29 = vmul.f32 %v1416_v28, %v628_v12  ;;  %v859_v30 = vpop.permute.xlu2 %858  ;;  %v1418_v33 = vpop.eup %1417  ;;  %v1320_v28 = vld [vmem:[%s1866_s9 + $0x18] sm:$0xff] }
 0x3e3   : > { %v864_v32 = vsel %vm638_vm10, %v859_v30, 0  ;;  %v703_v34 = vmul.f32 %v1418_v33, %v698_v63  ;;  %v1420_v37 = vpop.eup %1419  ;;  %v1319_v33 = vld [vmem:[%s1866_s9 + $0x10] sm:$0xff] }
 0x3e4   : > { %v634_v31 = vpack.c.bf16 %v633_v29, %v633_v29  ;;  %v853_v38 = vmul.f32 %v1420_v37, %v848_v1 }
 0x3e5   : > { %v704_v36 = vpack.c.bf16 %v703_v34, %v703_v34 }
 0x3e6   : > { %1247 = vmatmul.msk.bf16.vlgmr.msrb.gmra.mxu0 %vm599_vm9, %v634_v31  ;;  %v854_v39 = vpack.c.bf16 %v853_v38, %v853_v38  ;;  %v1318_v38 = vld [vmem:[%s1866_s9 + $0x8] sm:$0xff] }
 0x3e7   : > { %873 = vmatpush.bf16.msrb.mxu0 %v864_v32 }
 0x3f6   : > { %1249 = vmatmul.msk.bf16.vlgmr.msra.gmra.mxu0 %vm599_vm9, %v704_v36 }
 0x406   : > { %1253 = vmatmul.msk.bf16.vlgmr.msrb.gmra.mxu0 %vm599_vm9, %v854_v39 }
 0x45e   : > { %v800_v40 = vpop.f32.mrf.mxu2 }
 0x45f   : > { %v804_v41 = vpack.c.bf16 %v800_v40, %v800_v40 }
 0x461   : > { %806 = vrot.lane.b32.xlu1 %v804_v41, %s1544_s16 }
 0x463   : > { %v651_v42 = vpop.f32.mrf.mxu0 }
 0x464   : > { %v655_v43 = vpack.c.bf16 %v651_v42, %v651_v42  ;;  %v1317_v42 = vld [vmem:[%s1866_s9] sm:$0xff] }
 0x466   : > { %657 = vst.msk [vmem:[#allocation4] sm:$0xf] %vm656_vm11, %v655_v43  ;;  %v802_v44 = vpop.f32.mrf.mxu2 }
 0x46b   : > { %v653_v45 = vpop.f32.mrf.mxu0 }
 0x473   : > { %v725_v46 = vpop.f32.mrf.mxu0 }
 0x474   : > { %v729_v47 = vpack.c.bf16 %v725_v46, %v725_v46 }
 0x476   : > { %731 = vrot.lane.b32.xlu2 %v729_v47, %s1545_s15  ;;  %s1119_s15 = scalar_lea.hbm %s1884_s24, %s1306_s30 }
 0x477   : > { %s1123_s25 = sshll.u32 %s1119_s15, 4  ;;  %s1124_s25 = int_to_ptr.hbm [resolvable:$true] %s1123_s25 }
 0x478   : > { %s1469_s0 = sshra.s32 %s1124_s25, 4  ;;  %s1470_s0 = int_to_ptr.hbm [resolvable:$true] %s1469_s0 }
 0x479   : > { %s1471_s14 = scalar_lea.hbm %s1470_s0, 8  ;;  %p1476_p8 = scmp.lt.s32.totalorder %s1470_s0, %s1884_s24 }
 0x47a   : > { %p1472_p5 = scmp.ne.s32.totalorder %s1470_s0, %s1471_s14 }
 0x47b   : > { %v727_v48 = vpop.f32.mrf.mxu0 }
 0x47c   : > { %p1473_p6 = pnand %p1472_p5, %p1658_p9 }
 0x47e   : > { %p1474_p7 = pneg %p1473_p6 }
 0x483   : > { %v875_v49 = vpop.f32.mrf.mxu0 }
 0x484   : > { %v879_v50 = vpack.c.bf16 %v875_v49, %v875_v49 }
 0x486   : > { %881 = vrot.lane.b32.xlu2 %v879_v50, %s1546_s17  ;;  %s438_s17 = scalar_lea.vmem [#allocation8], %s1226_s27  ;;  %s1475_s27 = scalar_lea.hbm %s1884_s24, 16 }
 0x487   : > { %s1121_s11 = sshll.u32 %s438_s17, 4  ;;  %p1477_p10 = scmp.lt.s32.totalorder %s1475_s27, %s1471_s14  ;;  %s1122_s11 = int_to_ptr.vmem [resolvable:$true] %s1121_s11 }
 0x489   : > { %p1478_p13 = por %p1477_p10, %p1476_p8 }
 0x48b   : > { %v877_v51 = vpop.f32.mrf.mxu0  ;;  %p1479_p0 = pnand %p1478_p13, %p1474_p7 }
 0x4d0   : > { %v732_v54 = vpop.permute.xlu2 %731 }
 0x4d1   : > { %735 = vst.msk [vmem:[#allocation4] sm:$0xf] %vm734_vm12, %v732_v54 }
 0x4d3   : > { %v807_v55 = vpop.permute.xlu1 %806 }
 0x4d4   : > { %810 = vst.msk [vmem:[#allocation4] sm:$0xf] %vm809_vm13, %v807_v55 }
 0x4e0   : > { %v882_v56 = vpop.permute.xlu2 %881 }
 0x4e1   : > { %885 = vst.msk [vmem:[#allocation4] sm:$0xf] %vm884_vm14, %v882_v56 }
 0x4e8   : > { %v886_v57 = vld [vmem:[#allocation4] sm:$0xf] }
 0x4e9   : > { %1262 = vmatmul.msk.bf16.vlgmr.msra.gmra.mxu1 %vm453_vm0, %v886_v57 }
 0x566   : > { %v915_v58 = vpop.f32.mrf.mxu1 }
 0x567   : > { %v1771_v59 = vadd.f32 %v915_v58, %v1695_v3  ;;  %v1315_v3 = vld [vmem:[%s1864_s7] sm:$0xff] }
 0x568   : > { %973 = vmatpush.bf16.msra.mxu2 %v1315_v3 }
 0x569   : > { %v920_v60 = vsel %vm453_vm0, %v1771_v59, 0.0 }
 0x56a   : > { %921 = vadd.xlane.f32.xlu1 %v920_v60 }
 0x56e   : > { %v917_v61 = vpop.f32.mrf.mxu1 }
 0x5dd   : > { %v922_v62 = vpop.xlane.xlu1 %921 }
 0x5de   : > { %v923_v63 = vmul.f32 %v922_v62, %v1699_v11 }
 0x5e0   : > { %v924_v0 = vsub.f32 %v1771_v59, %v923_v63 }
 0x5e2   : > { %v925_v1 = vmul.f32 %v924_v0, %v924_v0 }
 0x5e4   : > { %v926_v2 = vsel %vm453_vm0, %v925_v1, 0.0 }
 0x5e5   : > { %927 = vadd.xlane.f32.xlu2 %v926_v2 }
 0x658   : > { %v928_v5 = vpop.xlane.xlu2 %927 }
 0x659   : > { %v929_v6 = vmul.f32 %v928_v5, %v1699_v11  ;;  %v1324_v11 = vld [vmem:[%s1866_s9 + $0x38] sm:$0xff] }
 0x65a   : > { %1092 = vmatpush.bf16.msra.mxu3 %v1324_v11 }
 0x65b   : > { %v930_v7 = vadd.f32 1e-05, %v929_v6  ;;  %v1398_v6 = vld [vmem:[%s1867_s10] ss:$0 sm:$0xff] }
 0x65d   : > { %1421 = vrsqrt.f32 %v930_v7  ;;  %vm937_vm1 = vweird.f32 %v930_v7 }
 0x65e   : > { %1093 = vmatpush.bf16.msra.mxu3 %v1323_v18 }
 0x662   : > { %1094 = vmatpush.bf16.msra.mxu3 %v1322_v21 }
 0x663   : > { %v1422_v8 = vpop.eup %1421 }
 0x664   : > { %v932_v9 = vmul.f32 %v1422_v8, %v930_v7  ;;  %vm938_vm15 = vweird.f32 %v1422_v8 }
 0x665   : > { %vm939_vm2 = vmor %vm937_vm1, %vm938_vm15 }
 0x666   : > { %v933_v10 = vmul.f32 %v1422_v8, %v932_v9  ;;  %1095 = vmatpush.bf16.msra.mxu3 %v1321_v24 }
 0x668   : > { %v934_v12 = vmul.f32 0.5, %v933_v10 }
 0x66a   : > { %v935_v13 = vsub.f32 1.5, %v934_v12  ;;  %1096 = vmatpush.bf16.msra.mxu3 %v1320_v28 }
 0x66c   : > { %v936_v14 = vmul.f32 %v1422_v8, %v935_v13 }
 0x66e   : > { %v940_v15 = vsel %vm939_vm2, %v1422_v8, %v936_v14  ;;  %1097 = vmatpush.bf16.msra.mxu3 %v1319_v33 }
 0x66f   : > { %v941_v16 = vmul.f32 %v940_v15, %v924_v0 }
 0x671   : > { %v942_v17 = vpack.c.bf16 %v941_v16, %v941_v16 }
 0x672   : > { %1098 = vmatpush.bf16.msra.mxu3 %v1318_v38 }
 0x673   : > { %1271 = vmatmul.msk.bf16.vlgmr.msra.gmra.mxu2 %vm453_vm0, %v942_v17 }
 0x676   : > { %1099 = vmatpush.bf16.msra.mxu3 %v1317_v42 }
 0x6f6   : > { %v975_v20 = vpop.f32.mrf.mxu2 }
 0x6f7   : > { %v976_v22 = vadd.f32 %v1397_v19, %v975_v20 }
 0x6f9   : > { %v980_v23 = vmul.f32 0.70710677, %v976_v22  ;;  %v979_v2 = vmul.f32 0.5, %v976_v22 }
 0x6fb   : > { %v981_v25 = vmul.f32 %v980_v23, %v980_v23 }
 0x6fd   : > { %v982_v26 = vmin.f32 %v981_v25, 16.0 }
 0x6fe   : > { %v977_v27 = vpop.f32.mrf.mxu2 }
 0x6ff   : > { %v983_v29 = vmul.f32 2.1237322e-06, %v982_v26  ;;  %v994_v30 = vmul.f32 3.8918573e-05, %v982_v26 }
 0x701   : > { %v984_v31 = vadd.f32 0.00028619796, %v983_v29  ;;  %v995_v32 = vadd.f32 0.001143296, %v994_v30 }
 0x703   : > { %v985_v34 = vmul.f32 %v984_v31, %v982_v26  ;;  %v996_v35 = vmul.f32 %v995_v32, %v982_v26 }
 0x705   : > { %v997_v36 = vadd.f32 0.014752088, %v996_v35  ;;  %v986_v37 = vadd.f32 0.0036580483, %v985_v34 }
 0x707   : > { %v998_v39 = vmul.f32 %v997_v36, %v982_v26  ;;  %v987_v41 = vmul.f32 %v986_v37, %v982_v26 }
 0x709   : > { %v999_v40 = vadd.f32 0.112945676, %v998_v39  ;;  %v988_v45 = vadd.f32 0.05243302, %v987_v41 }
 0x70b   : > { %v1000_v43 = vmul.f32 %v999_v40, %v982_v26  ;;  %v989_v48 = vmul.f32 %v988_v45, %v982_v26 }
 0x70d   : > { %v1001_v44 = vadd.f32 0.4994258, %v1000_v43  ;;  %v990_v49 = vadd.f32 0.18741608, %v989_v48 }
 0x70f   : > { %v1002_v46 = vmul.f32 %v1001_v44, %v982_v26  ;;  %v991_v51 = vmul.f32 %v990_v49, %v982_v26 }
 0x711   : > { %v1003_v47 = vadd.f32 1.0, %v1002_v46  ;;  %v992_v55 = vadd.f32 1.1283791, %v991_v51 }
 0x713   : > { %1423 = vrcp.f32 %v1003_v47  ;;  %v1015_v54 = vand.u32 2147483648, %v1003_v47  ;;  %v1013_v57 = vand.u32 2147483647, %v1003_v47  ;;  %vm1009_vm4 = vweird.f32 %v1003_v47 }
 0x714   : > { %v993_v61 = vmul.f32 %v992_v55, %v980_v23 }
 0x715   : > { %v1016_v60 = vor.u32 1.1754944e-38, %v1015_v54  ;;  %vm1014_vm6 = vcmp.eq.f32.partialorder %v1013_v57, 8.507059e+37 }
 0x719   : > { %v1424_v50 = vpop.eup %1423 }
 0x71a   : > { %v1005_v52 = vmul.f32 %v1424_v50, %v1003_v47  ;;  %vm1010_vm3 = vweird.f32 %v1424_v50 }
 0x71b   : > { %vm1011_vm5 = vmor %vm1009_vm4, %vm1010_vm3 }
 0x71c   : > { %v1006_v53 = vsub.f32 1.0, %v1005_v52 }
 0x71e   : > { %v1007_v56 = vmul.f32 %v1424_v50, %v1006_v53 }
 0x720   : > { %v1008_v58 = vadd.f32 %v1424_v50, %v1007_v56 }
 0x722   : > { %v1012_v62 = vsel %vm1011_vm5, %v1424_v50, %v1008_v58 }
 0x723   : > { %v1017_v63 = vsel %vm1014_vm6, %v1016_v60, %v1012_v62 }
 0x724   : > { %v1018_v0 = vmul.f32 %v1017_v63, %v993_v61 }
 0x726   : > { %v1272_v1 = vclamps-f32 %v1018_v0, 1.0 }
 0x728   : > { %v1021_v4 = vadd.f32 1.0, %v1272_v1 }
 0x72a   : > { %v1022_v3 = vmul.f32 %v1021_v4, %v979_v2 }
 0x72c   : > { %v1023_v5 = vpack.c.bf16 %v1022_v3, %v1022_v3 }
 0x72e   : > { %1100 = vmatmul.bf16.vlgmr.msra.gmra.mxu3 %v1023_v5 }
 0x7b1   : > { %v1101_v7 = vpop.f32.mrf.mxu3 }
 0x7b2   : > { %v1102_v8 = vadd.f32 %v1398_v6, %v1101_v7 }
 0x7b4   : > { %v1105_v9 = vadd.f32 %v1102_v8, %v1771_v59 }
 0x7b6   : > { %1106 = vst.msk [vmem:[%s438_s17] sm:$0xff] %vm453_vm0, %v1105_v9 }
 0x7b7   : > { %1482 = shalt.err (!%p1479_p0)
}
 0x7b8   : > { %1327 = dma.vmem_to_hbm [thread:$0]  (%p1658_p9), %s1122_s11, 128, %s1124_s25, %s1108_s20  }
 0x7b9   : > { %v1103_v59 = vpop.f32.mrf.mxu3 }
 0x7ba PF: > { %s1886_s26 = sld [smem:[#allocation11_spill]]  ;;  %p1334_p1 = pnand %p1221_p12, %p1665_p11 }
 0x7bc   : > { %p1335_p2 = pneg %p1334_p1 }
 0x7c0   : > { %s1135_s15 = sand.u32 1, %s1886_s26  }
 0x7c1   : > { %s1136_s17 = scalar_lea.sflag [#allocation7], %s1135_s15 }
 0x7c2   : > { %1512 = dma.done.wait (%p1335_p2), %s1136_s17, 128  }
 0x7c3   : > { %1514 = vsyncadd (%p1335_p2), %s1136_s17, 4294967168  ;;  %s27_s22 = sadd.s32 1, %s1537_s22   ;;  %s1887_s0 = sld [smem:[#allocation12_spill]] }
 0x7c4   : > { %p24_p3 = scmp.ge.s32.totalorder %s27_s22, 4   ;;  %s1888_s17 = smov %s1521_s18 }
 0x7c5   : > { %s1889_s18 = smov %s1525_s19  ;;  %s1890_s19 = smov %s1663_s12 }
 0x7c6   : > { %s1891_s20 = smov %s1533_s21  ;;  %26 = sbr.rel (!%p24_p3) target bundleno = 9 (0x9), region = 116 }
 0x7c9   : > { %s1892_s21 = smov %s1887_s0 }
 0x7cb   :  { %1142 = vsyncpa [#allocation6], 1 }
 0x7cc   :  { %1144 = vsyncpa [#allocation6 + $0x1], 1 }
 0x7cd   :  { %1145 = vsyncpa [#allocation7], 1 }
 0x7ce   :  { %1147 = vsyncpa [#allocation7 + $0x1], 1 }

</bundles_post_ra>
